<compile_context>
chip_gen: v7x
topology: tpu7x:2x2x1
jax: 0.10.0
libtpu: 0.0.40
codegen_flags: <defaults>
</compile_context>

<pallas_src>
from functools import partial

import jax
import jax.numpy as jnp
import numpy as np
from jax.experimental import pallas as pl
from jax.experimental.pallas import tpu as pltpu

C_IN = 128        # decoder final feature channels
C_OUT = 3         # RGB output channels
C_OUT_PAD = 8     # sublane pad for the output-channel axis
N_TAPS = 9        # 3x3 conv taps
GROUPS = 32       # GroupNorm groups (diffusers conv_norm_out)
EPS = 1e-6        # GroupNorm eps (diffusers conv_norm_out)


def _decode_part4_kernel(x_ref, halo_ref, scale_ref, shift_ref, w_ref, b_ref,
                         o_ref):
  """affine(GroupNorm) -> SiLU -> 3x3 conv (128 -> 8 padded), one row tile.

  Layout: channels on sublanes (K), pixels on lanes (N).  The conv is a single
  bf16 matmul (9*C_OUT_PAD, 128) @ (128, (TH+2)*W); the 9 tap partials are then
  combined with lane rolls (dx taps) + lane slices (dy taps) + edge masks.
  """
  _, C, L = x_ref.shape                       # L = TH * W   (main pixels)
  W = halo_ref.shape[-1] // 2
  L_full = L + 2 * W                          # with one halo row above/below

  scale = scale_ref[0]                        # (C, 1)  gamma * rstd
  shift = shift_ref[0]                        # (C, 1)  beta - mean*gamma*rstd

  # ---- GroupNorm affine + SiLU in f32, single bf16 cast --------------------
  y = x_ref[0].astype(jnp.float32) * scale + shift          # (C, L)
  y = y * jax.nn.sigmoid(y)
  y_bf = y.astype(jnp.bfloat16)

  hy = halo_ref[0, 0].astype(jnp.float32) * scale + shift   # (C, 2W)
  hy = hy * jax.nn.sigmoid(hy)
  # Conv zero padding must apply to the POST-SiLU activation: zero the halo
  # rows that lie outside the frame (top row of first tile / bottom of last).
  hi = pl.program_id(1)
  top_ok = (hi > 0).astype(jnp.float32)
  bot_ok = (hi < pl.num_programs(1) - 1).astype(jnp.float32)
  lane2 = jax.lax.broadcasted_iota(jnp.int32, (1, 2 * W), 1)
  hy = hy * jnp.where(lane2 < W, top_ok, bot_ok)
  hy_bf = hy.astype(jnp.bfloat16)

  # ---- row-padded activation and the single 9-tap matmul -------------------
  full = jnp.concatenate([hy_bf[:, :W], y_bf, hy_bf[:, W:]], axis=1)  # (C,L_full)
  partials = jnp.dot(w_ref[...], full,
                     preferred_element_type=jnp.float32)    # (9*8, L_full) f32

  # ---- combine taps: lane roll for dx, lane slice for dy, edge masks -------
  col = jax.lax.broadcasted_iota(jnp.int32, (C_OUT_PAD, L), 1) % W
  acc = jnp.zeros((C_OUT_PAD, L), jnp.float32)
  for dy in range(3):
    for dx in range(3):
      t = dy * 3 + dx
      part = partials[t * C_OUT_PAD:(t + 1) * C_OUT_PAD]    # (8, L_full)
      if dx == 0:                                           # needs column x-1
        part = pltpu.roll(part, 1, axis=1)
      elif dx == 2:                                         # needs column x+1
        part = pltpu.roll(part, L_full - 1, axis=1)
      sl = part[:, dy * W: dy * W + L]                      # (8, L)
      if dx == 0:
        sl = jnp.where(col == 0, 0.0, sl)
      elif dx == 2:
        sl = jnp.where(col == W - 1, 0.0, sl)
      acc = acc + sl
  o_ref[0] = acc + b_ref[...]                               # add bias, (8, L)


def _vmem_plan():
  """(per-step working-set budget, vmem_limit_bytes) per TPU generation."""
  try:
    cap = int(pltpu.get_tpu_info().vmem_capacity_bytes)
  except Exception:
    cap = 64 * 1024 * 1024                      # assume v7x-like if unknown
  if cap >= 96 * 1024 * 1024:                   # v5e / v6e: 128 MiB physical
    return 80 * 1024 * 1024, 100 * 1024 * 1024
  return 28 * 1024 * 1024, 48 * 1024 * 1024     # v7x: 64 MiB physical


def _pick_tile_h(h, w, c, bt, budget_bytes):
  """Largest row tile TH (dividing H, lane-legal) whose working set fits."""
  def step_bytes(th):
    lm, lf = th * w, (th + 2) * w
    return (2 * c * lm * 4                  # input block (double-buffered f32)
            + c * lm * 4                    # post affine+SiLU f32
            + c * lm * 2                    # bf16 main
            + c * lf * 2                    # bf16 row-padded concat
            + N_TAPS * C_OUT_PAD * lf * 4   # 9-tap partial f32
            + 3 * C_OUT_PAD * lm * 4        # combine temporaries / accumulator
            + 2 * C_OUT_PAD * lm * 4)       # output block (double-buffered f32)
  legal = [th for th in range(1, h + 1)
           if h % th == 0 and ((th * w) % 128 == 0 or th == h)]
  fit = [th for th in legal if step_bytes(th) <= budget_bytes]
  if not fit:
    return min(legal)
  if bt == 1:                                # keep both v7x TensorCores busy
    multi = [th for th in fit if (h // th) % 2 == 0]
    if multi:
      return max(multi)
  return max(fit)


@partial(jax.jit, static_argnames=("tile_h",))
def vae_wrapper_spatial4(x_nchw, gamma, beta, conv_w, conv_b, *, tile_h=None):
  """x_nchw: (B*T, 128, H, W) f32  ->  (1, 3, T, H, W) f32."""
  BT, C, H, W = x_nchw.shape
  assert C == C_IN

  x32 = x_nchw.astype(jnp.float32)

  # ---- GroupNorm stats: cheap XLA reduce, folded into per-channel affine ----
  xg = x32.reshape(BT, GROUPS, (C // GROUPS) * H * W)
  g_mean = jnp.mean(xg, axis=2)                              # (BT, G)
  g_rstd = jax.lax.rsqrt(jnp.var(xg, axis=2) + EPS)          # (BT, G)
  mean_c = jnp.repeat(g_mean, C // GROUPS, axis=1)           # (BT, C)
  rstd_c = jnp.repeat(g_rstd, C // GROUPS, axis=1)           # (BT, C)
  scale_c = (gamma[None, :] * rstd_c).reshape(BT, C, 1).astype(jnp.float32)
  shift_c = (beta[None, :] - mean_c * gamma[None, :] * rstd_c)
  shift_c = shift_c.reshape(BT, C, 1).astype(jnp.float32)

  # ---- tiling ---------------------------------------------------------------
  budget, vmem_limit = _vmem_plan()
  TH = tile_h if tile_h is not None else _pick_tile_h(H, W, C, BT, budget)
  assert H % TH == 0 and ((TH * W) % 128 == 0 or TH == H)
  nH = H // TH

  # NCHW consumed directly; (H, W) merged into one lane axis (free reshape).
  x_flat = x32.reshape(BT, C, H * W)

  # Halo rows (row above / below each tile).  Frame-edge rows are zeroed
  # post-SiLU inside the kernel, so a clipped gather is fine here.
  starts = jnp.arange(nH) * TH
  top = x32[:, :, jnp.clip(starts - 1, 0, H - 1), :]         # (BT, C, nH, W)
  bot = x32[:, :, jnp.clip(starts + TH, 0, H - 1), :]        # (BT, C, nH, W)
  halos = jnp.stack([top, bot], axis=3)                      # (BT, C, nH, 2, W)
  halos = jnp.transpose(halos, (0, 2, 1, 3, 4)).reshape(BT, nH, C, 2 * W)

  # ---- conv weights: (dy, dx, c_out) stacked on M, bf16 for the MXU --------
  w_t = jnp.transpose(conv_w.astype(jnp.float32), (0, 1, 3, 2))  # (3,3,O,C)
  w_pad = jnp.zeros((3, 3, C_OUT_PAD, C_IN), jnp.float32)
  w_pad = w_pad.at[:, :, :C_OUT, :].set(w_t)
  w_all = w_pad.reshape(N_TAPS * C_OUT_PAD, C_IN).astype(jnp.bfloat16)
  b_pad = jnp.zeros((C_OUT_PAD, 1), jnp.float32)
  b_pad = b_pad.at[:C_OUT, 0].set(conv_b.astype(jnp.float32))

  out = pl.pallas_call(
      _decode_part4_kernel,
      out_shape=jax.ShapeDtypeStruct((BT, C_OUT_PAD, H * W), jnp.float32),
      grid_spec=pltpu.PrefetchScalarGridSpec(
          num_scalar_prefetch=0,
          grid=(BT, nH),
          in_specs=[
              pl.BlockSpec((1, C, TH * W), lambda b, h: (b, 0, h)),
              pl.BlockSpec((1, 1, C, 2 * W), lambda b, h: (b, h, 0, 0)),
              pl.BlockSpec((1, C, 1), lambda b, h: (b, 0, 0)),
              pl.BlockSpec((1, C, 1), lambda b, h: (b, 0, 0)),
              pl.BlockSpec((N_TAPS * C_OUT_PAD, C_IN), lambda b, h: (0, 0)),
              pl.BlockSpec((C_OUT_PAD, 1), lambda b, h: (0, 0)),
          ],
          out_specs=pl.BlockSpec((1, C_OUT_PAD, TH * W),
                                 lambda b, h: (b, 0, h)),
      ),
      compiler_params=pltpu.CompilerParams(
          dimension_semantics=("parallel", "parallel"),
          vmem_limit_bytes=vmem_limit),
  )(x_flat, halos, scale_c, shift_c, w_all, b_pad)

  y = out[:, :C_OUT, :].reshape(BT, C_OUT, H, W)             # small slice
  # rearrange '(B T) C H W -> B C T H W' with B=1
  return jnp.transpose(y, (1, 0, 2, 3))[None]                # (1, 3, T, H, W)


def _reference(x_nchw, gamma, beta, conv_w, conv_b):
  """Pure-JAX reference of the same forward pass (for verification)."""
  BT, C, H, W = x_nchw.shape
  xg = x_nchw.reshape(BT, GROUPS, C // GROUPS, H, W)
  mean = xg.mean(axis=(2, 3, 4), keepdims=True)
  var = xg.var(axis=(2, 3, 4), keepdims=True)
  xn = (xg - mean) / jnp.sqrt(var + EPS)
  xn = xn.reshape(BT, C, H, W) * gamma[None, :, None, None] + beta[None, :, None, None]
  y = xn * jax.nn.sigmoid(xn)
  out = jax.lax.conv_general_dilated(
      y, jnp.transpose(conv_w, (3, 2, 0, 1)),   # HWIO -> OIHW
      window_strides=(1, 1), padding="SAME",
      dimension_numbers=("NCHW", "OIHW", "NCHW"))
  out = out + conv_b[None, :, None, None]
  return jnp.transpose(out, (1, 0, 2, 3))[None]


if __name__ == "__main__":
  key = jax.random.PRNGKey(0)
  k_x, k_g, k_b, k_w, k_cb = jax.random.split(key, 5)

  # Small shapes consistent with the module: B=1, T=2, 128 decoder channels.
  BT, H, W = 2, 16, 16
  x = jax.random.normal(k_x, (BT, C_IN, H, W), dtype=jnp.float32)

  # Deterministic synthetic parameters (GroupNorm affine + conv_out weights).
  gamma = 1.0 + 0.05 * jax.random.normal(k_g, (C_IN,), dtype=jnp.float32)
  beta = 0.05 * jax.random.normal(k_b, (C_IN,), dtype=jnp.float32)
  w_scale = 1.0 / np.sqrt(9 * C_IN)
  conv_w = w_scale * jax.random.normal(k_w, (3, 3, C_IN, C_OUT), dtype=jnp.float32)
  conv_b = 0.01 * jax.random.normal(k_cb, (C_OUT,), dtype=jnp.float32)

  ref = jax.block_until_ready(_reference(x, gamma, beta, conv_w, conv_b))

  # Default tiling (single row tile per frame: exercises frame-edge halos)
  # and a forced 2-tile split (exercises the interior-halo path).
  out_auto = jax.block_until_ready(
      vae_wrapper_spatial4(x, gamma, beta, conv_w, conv_b))
  out_split = jax.block_until_ready(
      vae_wrapper_spatial4(x, gamma, beta, conv_w, conv_b, tile_h=8))

  for out in (out_auto, out_split):
    assert out.shape == (1, C_OUT, BT, H, W), out.shape
    np.testing.assert_allclose(np.asarray(out), np.asarray(ref),
                               atol=2e-2, rtol=2e-2)
  print("KERNEL_OK")
</pallas_src>

<mosaic_0001>
module attributes {stable_mosaic.version = 11 : i64} {
  func.func @_decode_part4_kernel(%arg0: i32, %arg1: i32, %arg2: memref<1x128x256xf32, #tpu.memory_space<vmem>>, %arg3: memref<1x1x128x32xf32, #tpu.memory_space<vmem>>, %arg4: memref<1x128x1xf32, #tpu.memory_space<vmem>>, %arg5: memref<1x128x1xf32, #tpu.memory_space<vmem>>, %arg6: memref<72x128xbf16, #tpu.memory_space<vmem>>, %arg7: memref<8x1xf32, #tpu.memory_space<vmem>>, %arg8: memref<1x8x256xf32, #tpu.memory_space<vmem>>) attributes {dimension_semantics = [#tpu.dimension_semantics<parallel>, #tpu.dimension_semantics<parallel>], iteration_bounds = array<i64: 2, 1>, scalar_prefetch = 0 : i64, scratch_operands = 0 : i64, tpu.core_type = #tpu.core_type<tc>, window_params = [{transform_indices = @transform_0, window_bounds = array<i64: 1, 128, 256>}, {transform_indices = @transform_1, window_bounds = array<i64: 1, 1, 128, 32>}, {transform_indices = @transform_2, window_bounds = array<i64: 1, 128, 1>}, {transform_indices = @transform_3, window_bounds = array<i64: 1, 128, 1>}, {pipeline_mode = #tpu.pipeline_mode<synchronous>, transform_indices = @transform_4, window_bounds = array<i64: 72, 128>}, {pipeline_mode = #tpu.pipeline_mode<synchronous>, transform_indices = @transform_5, window_bounds = array<i64: 8, 1>}, {transform_indices = @transform_6, window_bounds = array<i64: 1, 8, 256>}]} {
    %c0 = arith.constant 0 : index
    %c0_0 = arith.constant 0 : index
    %c0_1 = arith.constant 0 : index
    %0 = vector.load %arg4[%c0, %c0_0, %c0_1] : memref<1x128x1xf32, #tpu.memory_space<vmem>>, vector<1x128x1xf32>
    %1 = vector.shape_cast %0 : vector<1x128x1xf32> to vector<128x1xf32>
    %c0_2 = arith.constant 0 : index
    %c0_3 = arith.constant 0 : index
    %c0_4 = arith.constant 0 : index
    %2 = vector.load %arg5[%c0_2, %c0_3, %c0_4] : memref<1x128x1xf32, #tpu.memory_space<vmem>>, vector<1x128x1xf32>
    %3 = vector.shape_cast %2 : vector<1x128x1xf32> to vector<128x1xf32>
    %c0_5 = arith.constant 0 : index
    %c0_6 = arith.constant 0 : index
    %c0_7 = arith.constant 0 : index
    %4 = vector.load %arg2[%c0_5, %c0_6, %c0_7] : memref<1x128x256xf32, #tpu.memory_space<vmem>>, vector<1x128x256xf32>
    %5 = vector.shape_cast %4 : vector<1x128x256xf32> to vector<128x256xf32>
    %6 = vector.broadcast %1 : vector<128x1xf32> to vector<128x256xf32>
    %7 = arith.mulf %5, %6 : vector<128x256xf32>
    %8 = vector.broadcast %3 : vector<128x1xf32> to vector<128x256xf32>
    %9 = arith.addf %7, %8 : vector<128x256xf32>
    %10 = arith.negf %9 : vector<128x256xf32>
    %11 = math.exp %10 : vector<128x256xf32>
    %cst = arith.constant 1.000000e+00 : f32
    %12 = vector.broadcast %cst : f32 to vector<128x256xf32>
    %13 = arith.addf %12, %11 : vector<128x256xf32>
    %14 = arith.divf %12, %13 : vector<128x256xf32>
    %15 = arith.mulf %9, %14 : vector<128x256xf32>
    %16 = arith.truncf %15 : vector<128x256xf32> to vector<128x256xbf16>
    %c0_8 = arith.constant 0 : index
    %c0_9 = arith.constant 0 : index
    %c0_10 = arith.constant 0 : index
    %c0_11 = arith.constant 0 : index
    %17 = vector.load %arg3[%c0_8, %c0_9, %c0_10, %c0_11] : memref<1x1x128x32xf32, #tpu.memory_space<vmem>>, vector<1x1x128x32xf32>
    %18 = vector.shape_cast %17 : vector<1x1x128x32xf32> to vector<128x32xf32>
    %19 = vector.broadcast %1 : vector<128x1xf32> to vector<128x32xf32>
    %20 = arith.mulf %18, %19 : vector<128x32xf32>
    %21 = vector.broadcast %3 : vector<128x1xf32> to vector<128x32xf32>
    %22 = arith.addf %20, %21 : vector<128x32xf32>
    %23 = arith.negf %22 : vector<128x32xf32>
    %24 = math.exp %23 : vector<128x32xf32>
    %cst_12 = arith.constant 1.000000e+00 : f32
    %25 = vector.broadcast %cst_12 : f32 to vector<128x32xf32>
    %26 = arith.addf %25, %24 : vector<128x32xf32>
    %27 = arith.divf %25, %26 : vector<128x32xf32>
    %28 = arith.mulf %22, %27 : vector<128x32xf32>
    %c0_i32 = arith.constant 0 : i32
    %29 = arith.cmpi sgt, %arg1, %c0_i32 : i32
    %30 = arith.extui %29 : i1 to i32
    %31 = arith.sitofp %30 : i32 to f32
    %c0_i32_13 = arith.constant 0 : i32
    %32 = arith.cmpi slt, %arg1, %c0_i32_13 : i32
    %33 = arith.extui %32 : i1 to i32
    %34 = arith.sitofp %33 : i32 to f32
    %35 = tpu.iota {dimensions = array<i32: 1>} : vector<1x32xi32>
    %c16_i32 = arith.constant 16 : i32
    %36 = vector.broadcast %c16_i32 : i32 to vector<1x32xi32>
    %37 = arith.cmpi slt, %35, %36 : vector<1x32xi32>
    %38 = vector.broadcast %31 : f32 to vector<1x32xf32>
    %39 = vector.broadcast %34 : f32 to vector<1x32xf32>
    %40 = arith.select %37, %38, %39 : vector<1x32xi1>, vector<1x32xf32>
    %41 = vector.broadcast %40 : vector<1x32xf32> to vector<128x32xf32>
    %42 = arith.mulf %28, %41 : vector<128x32xf32>
    %43 = arith.truncf %42 : vector<128x32xf32> to vector<128x32xbf16>
    %44 = vector.extract_strided_slice %43 {offsets = [0, 0], sizes = [128, 16], strides = [1, 1]} : vector<128x32xbf16> to vector<128x16xbf16>
    %45 = vector.extract_strided_slice %43 {offsets = [0, 16], sizes = [128, 16], strides = [1, 1]} : vector<128x32xbf16> to vector<128x16xbf16>
    %46 = tpu.concatenate %44, %16, %45 in 1 : vector<128x16xbf16>, vector<128x256xbf16>, vector<128x16xbf16> -> vector<128x288xbf16>
    %c0_14 = arith.constant 0 : index
    %c0_15 = arith.constant 0 : index
    %47 = vector.load %arg6[%c0_14, %c0_15] : memref<72x128xbf16, #tpu.memory_space<vmem>>, vector<72x128xbf16>
    %cst_16 = arith.constant dense<0.000000e+00> : vector<72x288xf32>
    %48 = tpu.matmul %47, %46, %cst_16 {dimension_numbers = #tpu.dot_dimension_numbers<[1], [0], [0], [1], [0, 0, 1, 1], [], []>} : vector<72x128xbf16>, vector<128x288xbf16>, vector<72x288xf32> -> vector<72x288xf32>
    %49 = tpu.iota {dimensions = array<i32: 1>} : vector<8x256xi32>
    %c16_i32_17 = arith.constant 16 : i32
    %c0_i32_18 = arith.constant 0 : i32
    %50 = arith.cmpi eq, %c16_i32_17, %c0_i32_18 : i32
    %c1_i32 = arith.constant 1 : i32
    %51 = arith.select %50, %c1_i32, %c16_i32_17 : i32
    %52 = vector.broadcast %51 : i32 to vector<8x256xi32>
    %53 = arith.remsi %49, %52 : vector<8x256xi32>
    %c0_i32_19 = arith.constant 0 : i32
    %54 = vector.broadcast %c0_i32_19 : i32 to vector<8x256xi32>
    %55 = arith.cmpi ne, %53, %54 : vector<8x256xi32>
    %c0_i32_20 = arith.constant 0 : i32
    %56 = vector.broadcast %c0_i32_20 : i32 to vector<8x256xi32>
    %57 = arith.cmpi slt, %53, %56 : vector<8x256xi32>
    %c0_i32_21 = arith.constant 0 : i32
    %58 = arith.cmpi slt, %51, %c0_i32_21 : i32
    %59 = vector.broadcast %58 : i1 to vector<8x256xi1>
    %60 = vector.broadcast %59 : vector<8x256xi1> to vector<8x256xi1>
    %61 = arith.xori %57, %60 : vector<8x256xi1>
    %62 = arith.andi %61, %55 : vector<8x256xi1>
    %63 = vector.broadcast %51 : i32 to vector<8x256xi32>
    %64 = arith.addi %53, %63 : vector<8x256xi32>
    %65 = arith.select %62, %64, %53 : vector<8x256xi1>, vector<8x256xi32>
    %cst_22 = arith.constant 0.000000e+00 : f32
    %66 = vector.broadcast %cst_22 : f32 to vector<8x256xf32>
    %67 = vector.extract_strided_slice %48 {offsets = [0, 0], sizes = [8, 288], strides = [1, 1]} : vector<72x288xf32> to vector<8x288xf32>
    %c1_i32_23 = arith.constant 1 : i32
    %68 = tpu.dynamic_rotate %67 by %c1_i32_23 dim 1 : vector<8x288xf32>, i32 -> vector<8x288xf32>
    %69 = vector.extract_strided_slice %68 {offsets = [0, 0], sizes = [8, 256], strides = [1, 1]} : vector<8x288xf32> to vector<8x256xf32>
    %c0_i32_24 = arith.constant 0 : i32
    %70 = vector.broadcast %c0_i32_24 : i32 to vector<8x256xi32>
    %71 = arith.cmpi eq, %65, %70 : vector<8x256xi32>
    %cst_25 = arith.constant 0.000000e+00 : f32
    %72 = vector.broadcast %cst_25 : f32 to vector<8x256xf32>
    %73 = arith.select %71, %72, %69 : vector<8x256xi1>, vector<8x256xf32>
    %74 = arith.addf %66, %73 : vector<8x256xf32>
    %75 = vector.extract_strided_slice %48 {offsets = [8, 0], sizes = [8, 288], strides = [1, 1]} : vector<72x288xf32> to vector<8x288xf32>
    %76 = vector.extract_strided_slice %75 {offsets = [0, 0], sizes = [8, 256], strides = [1, 1]} : vector<8x288xf32> to vector<8x256xf32>
    %77 = arith.addf %74, %76 : vector<8x256xf32>
    %78 = vector.extract_strided_slice %48 {offsets = [16, 0], sizes = [8, 288], strides = [1, 1]} : vector<72x288xf32> to vector<8x288xf32>
    %c287_i32 = arith.constant 287 : i32
    %79 = tpu.dynamic_rotate %78 by %c287_i32 dim 1 : vector<8x288xf32>, i32 -> vector<8x288xf32>
    %80 = vector.extract_strided_slice %79 {offsets = [0, 0], sizes = [8, 256], strides = [1, 1]} : vector<8x288xf32> to vector<8x256xf32>
    %c15_i32 = arith.constant 15 : i32
    %81 = vector.broadcast %c15_i32 : i32 to vector<8x256xi32>
    %82 = arith.cmpi eq, %65, %81 : vector<8x256xi32>
    %cst_26 = arith.constant 0.000000e+00 : f32
    %83 = vector.broadcast %cst_26 : f32 to vector<8x256xf32>
    %84 = arith.select %82, %83, %80 : vector<8x256xi1>, vector<8x256xf32>
    %85 = arith.addf %77, %84 : vector<8x256xf32>
    %86 = vector.extract_strided_slice %48 {offsets = [24, 0], sizes = [8, 288], strides = [1, 1]} : vector<72x288xf32> to vector<8x288xf32>
    %c1_i32_27 = arith.constant 1 : i32
    %87 = tpu.dynamic_rotate %86 by %c1_i32_27 dim 1 : vector<8x288xf32>, i32 -> vector<8x288xf32>
    %88 = vector.extract_strided_slice %87 {offsets = [0, 16], sizes = [8, 256], strides = [1, 1]} : vector<8x288xf32> to vector<8x256xf32>
    %c0_i32_28 = arith.constant 0 : i32
    %89 = vector.broadcast %c0_i32_28 : i32 to vector<8x256xi32>
    %90 = arith.cmpi eq, %65, %89 : vector<8x256xi32>
    %cst_29 = arith.constant 0.000000e+00 : f32
    %91 = vector.broadcast %cst_29 : f32 to vector<8x256xf32>
    %92 = arith.select %90, %91, %88 : vector<8x256xi1>, vector<8x256xf32>
    %93 = arith.addf %85, %92 : vector<8x256xf32>
    %94 = vector.extract_strided_slice %48 {offsets = [32, 0], sizes = [8, 288], strides = [1, 1]} : vector<72x288xf32> to vector<8x288xf32>
    %95 = vector.extract_strided_slice %94 {offsets = [0, 16], sizes = [8, 256], strides = [1, 1]} : vector<8x288xf32> to vector<8x256xf32>
    %96 = arith.addf %93, %95 : vector<8x256xf32>
    %97 = vector.extract_strided_slice %48 {offsets = [40, 0], sizes = [8, 288], strides = [1, 1]} : vector<72x288xf32> to vector<8x288xf32>
    %c287_i32_30 = arith.constant 287 : i32
    %98 = tpu.dynamic_rotate %97 by %c287_i32_30 dim 1 : vector<8x288xf32>, i32 -> vector<8x288xf32>
    %99 = vector.extract_strided_slice %98 {offsets = [0, 16], sizes = [8, 256], strides = [1, 1]} : vector<8x288xf32> to vector<8x256xf32>
    %c15_i32_31 = arith.constant 15 : i32
    %100 = vector.broadcast %c15_i32_31 : i32 to vector<8x256xi32>
    %101 = arith.cmpi eq, %65, %100 : vector<8x256xi32>
    %cst_32 = arith.constant 0.000000e+00 : f32
    %102 = vector.broadcast %cst_32 : f32 to vector<8x256xf32>
    %103 = arith.select %101, %102, %99 : vector<8x256xi1>, vector<8x256xf32>
    %104 = arith.addf %96, %103 : vector<8x256xf32>
    %105 = vector.extract_strided_slice %48 {offsets = [48, 0], sizes = [8, 288], strides = [1, 1]} : vector<72x288xf32> to vector<8x288xf32>
    %c1_i32_33 = arith.constant 1 : i32
    %106 = tpu.dynamic_rotate %105 by %c1_i32_33 dim 1 : vector<8x288xf32>, i32 -> vector<8x288xf32>
    %107 = vector.extract_strided_slice %106 {offsets = [0, 32], sizes = [8, 256], strides = [1, 1]} : vector<8x288xf32> to vector<8x256xf32>
    %c0_i32_34 = arith.constant 0 : i32
    %108 = vector.broadcast %c0_i32_34 : i32 to vector<8x256xi32>
    %109 = arith.cmpi eq, %65, %108 : vector<8x256xi32>
    %cst_35 = arith.constant 0.000000e+00 : f32
    %110 = vector.broadcast %cst_35 : f32 to vector<8x256xf32>
    %111 = arith.select %109, %110, %107 : vector<8x256xi1>, vector<8x256xf32>
    %112 = arith.addf %104, %111 : vector<8x256xf32>
    %113 = vector.extract_strided_slice %48 {offsets = [56, 0], sizes = [8, 288], strides = [1, 1]} : vector<72x288xf32> to vector<8x288xf32>
    %114 = vector.extract_strided_slice %113 {offsets = [0, 32], sizes = [8, 256], strides = [1, 1]} : vector<8x288xf32> to vector<8x256xf32>
    %115 = arith.addf %112, %114 : vector<8x256xf32>
    %116 = vector.extract_strided_slice %48 {offsets = [64, 0], sizes = [8, 288], strides = [1, 1]} : vector<72x288xf32> to vector<8x288xf32>
    %c287_i32_36 = arith.constant 287 : i32
    %117 = tpu.dynamic_rotate %116 by %c287_i32_36 dim 1 : vector<8x288xf32>, i32 -> vector<8x288xf32>
    %118 = vector.extract_strided_slice %117 {offsets = [0, 32], sizes = [8, 256], strides = [1, 1]} : vector<8x288xf32> to vector<8x256xf32>
    %c15_i32_37 = arith.constant 15 : i32
    %119 = vector.broadcast %c15_i32_37 : i32 to vector<8x256xi32>
    %120 = arith.cmpi eq, %65, %119 : vector<8x256xi32>
    %cst_38 = arith.constant 0.000000e+00 : f32
    %121 = vector.broadcast %cst_38 : f32 to vector<8x256xf32>
    %122 = arith.select %120, %121, %118 : vector<8x256xi1>, vector<8x256xf32>
    %123 = arith.addf %115, %122 : vector<8x256xf32>
    %c0_39 = arith.constant 0 : index
    %c0_40 = arith.constant 0 : index
    %124 = vector.load %arg7[%c0_39, %c0_40] : memref<8x1xf32, #tpu.memory_space<vmem>>, vector<8x1xf32>
    %125 = vector.broadcast %124 : vector<8x1xf32> to vector<8x256xf32>
    %126 = arith.addf %123, %125 : vector<8x256xf32>
    %c0_41 = arith.constant 0 : index
    %c0_42 = arith.constant 0 : index
    %c0_43 = arith.constant 0 : index
    %127 = vector.load %arg8[%c0_41, %c0_42, %c0_43] : memref<1x8x256xf32, #tpu.memory_space<vmem>>, vector<1x8x256xf32>
    %128 = vector.shape_cast %127 : vector<1x8x256xf32> to vector<8x256xf32>
    %129 = vector.shape_cast %126 : vector<8x256xf32> to vector<1x8x256xf32>
    tpu.vector_store %arg8[%c0_41, %c0_42, %c0_43], %129 {strides = array<i32>} : memref<1x8x256xf32, #tpu.memory_space<vmem>>, vector<1x8x256xf32>,
    return
  }
  func.func @transform_0(%arg0: i32, %arg1: i32) -> (i32, i32, i32) {
    %c0_i32 = arith.constant 0 : i32
    %c0_i32_0 = arith.constant 0 : i32
    return %arg0, %c0_i32, %arg1 : i32, i32, i32
  }
  func.func @transform_1(%arg0: i32, %arg1: i32) -> (i32, i32, i32, i32) {
    %c0_i32 = arith.constant 0 : i32
    %c0_i32_0 = arith.constant 0 : i32
    %c0_i32_1 = arith.constant 0 : i32
    return %arg0, %arg1, %c0_i32, %c0_i32_0 : i32, i32, i32, i32
  }
  func.func @transform_2(%arg0: i32, %arg1: i32) -> (i32, i32, i32) {
    %c0_i32 = arith.constant 0 : i32
    %c0_i32_0 = arith.constant 0 : i32
    %c0_i32_1 = arith.constant 0 : i32
    return %arg0, %c0_i32, %c0_i32_0 : i32, i32, i32
  }
  func.func @transform_3(%arg0: i32, %arg1: i32) -> (i32, i32, i32) {
    %c0_i32 = arith.constant 0 : i32
    %c0_i32_0 = arith.constant 0 : i32
    %c0_i32_1 = arith.constant 0 : i32
    return %arg0, %c0_i32, %c0_i32_0 : i32, i32, i32
  }
  func.func @transform_4(%arg0: i32, %arg1: i32) -> (i32, i32) {
    %c0_i32 = arith.constant 0 : i32
    %c0_i32_0 = arith.constant 0 : i32
    %c0_i32_1 = arith.constant 0 : i32
    return %c0_i32, %c0_i32_0 : i32, i32
  }
  func.func @transform_5(%arg0: i32, %arg1: i32) -> (i32, i32) {
    %c0_i32 = arith.constant 0 : i32
    %c0_i32_0 = arith.constant 0 : i32
    %c0_i32_1 = arith.constant 0 : i32
    return %c0_i32, %c0_i32_0 : i32, i32
  }
  func.func @transform_6(%arg0: i32, %arg1: i32) -> (i32, i32, i32) {
    %c0_i32 = arith.constant 0 : i32
    %c0_i32_0 = arith.constant 0 : i32
    return %arg0, %c0_i32, %arg1 : i32, i32, i32
  }
}

</mosaic_0001>

<bundles_post_ra>
// kernel: vae_wrapper_spatial4.1
= control target key start
LH: loop header
LB: loop body
LE: loop exit
PB: predicated region body
PF: predicated region fallthrough
CT: control target
= control target key end

     0   :  { %s2183_s21 = smov 0   ;;  %s2185_s22 = smov 0   ;;  %s2811_s0 = inlined_call_operand.vmem [shape: f32[2,128,256], index: 0, kind: input, shape index: {}]   ;;  %s2812_s1 = inlined_call_operand.vmem [shape: f32[2,1,128,32], index: 1, kind: input, shape index: {}]   ;;  %s2813_s2 = inlined_call_operand.vmem [shape: f32[2,128,1], index: 2, kind: input, shape index: {}]   ;;  %s2814_s3 = inlined_call_operand.vmem [shape: f32[2,128,1], index: 3, kind: input, shape index: {}]   ;;  %s2815_s4 = inlined_call_operand.vmem [shape: bf16[72,128], index: 4, kind: input, shape index: {}]   ;;  %s2816_s5 = inlined_call_operand.vmem [shape: f32[8,1], index: 5, kind: input, shape index: {}]   ;;  %s2817_s6 = inlined_call_operand.vmem [shape: f32[2,8,256], index: 6, kind: output, shape index: {}]  }
   0x1   :  { %s2187_s23 = smov 0  }
   0x2 LB: > { %s28_s24 = sadd.s32 1, %s2129_s22  ;;  %p1755_p0 = scmp.ge.s32.totalorder %s2133_s23, 1  ;;  %s2133_s23 = sphi %s2187_s23, %s16_s23   ;;  %s2129_s22 = sphi %s2185_s22, %s2827_s22   ;;  %s2125_s21 = sphi %s2183_s21, %s2826_s21  }
   0x3   : > { %p30_p1 = scmp.ge.s32.totalorder %s28_s24, 2  ;;  %p269_p2 = scmp.lt.s32.totalorder %s2133_s23, 3 }
   0x5   : > { %s2829_s24 = smov (%p30_p1, %s28_s24), 0  ;;  %p270_p3 = pnand %p1755_p0, %p269_p2 }
   0x6   : > { %p327_p4 = scmp.lt.s32.totalorder (!%p270_p3), %s2125_s21, 1  ;;  %v2135_v0 = vmov (!%p270_p3), 0   ;;  %s2136_s15 = smov (!%p270_p3), 16   ;;  %vm2138_vm0 = vmmov (!%p270_p3), 0   ;;  %vm1138_vm1 = vcmask (!%p270_p3), 130048   ;;  %vm1426_vm2 = vcmask (!%p270_p3), 1047808  }
   0x7   : > { %273 = sbr.rel (%p270_p3) target bundleno = 1004 (0x3ec), region = 44  ;;  %1913 = vset.pattern.permute.xlu1 (!%p270_p3), %v2135_v0  ;;  %1912 = vset.pattern.permute.xlu0 (!%p270_p3), %v2135_v0  ;;  %s2139_s30 = smov (!%p270_p3), 32   ;;  %vm1447_vm3 = vcmask (!%p270_p3), 793600   ;;  %vm1472_vm4 = vcmask (!%p270_p3), 1039360   ;;  %vm1499_vm6 = vcmask (!%p270_p3), 662528   ;;  %vm1536_vm10 = vcmask (!%p270_p3), 908288  }
   0x8   : > { %1281 = vmatprep.mubr.bf16.mxu0 (!%p270_p3), %v2135_v0  ;;  %s2142_s9 = smov (!%p270_p3), 81   ;;  %s2143_s10 = smov (!%p270_p3), 112   ;;  %vm1517_vm11 = vcmask (!%p270_p3), 916480   ;;  %vm1563_vm12 = vcmask (!%p270_p3), 531456   ;;  %vm1581_vm13 = vcmask (!%p270_p3), 785408   ;;  %vm1600_vm14 = vcmask (!%p270_p3), 777216  }
   0x9   : > { %s2147_s16 = smov (!%p270_p3), 95  }
   0xe   : > { %s2831_s21 = smov (!%p327_p4, %s2125_s21), 1 }
   0xf   : > { %s2207_s25 = sshll.u32 %s2831_s21, 7  ;;  %s1821_s8 = sshll.u32 %s2831_s21, 8 }
  0x10   : > { %s2213_s28 = scalar_lea.vmem %s2814_s3, %s2207_s25  ;;  %s2220_s7 = scalar_lea.vmem %s2813_s2, %s2207_s25 }
  0x11   : > { %v382_v1 = vld [vmem:[%s2213_s28] sm:$0xff]  ;;  %v383_v3 = vld [vmem:[%s2213_s28 + $0x8] sm:$0xff]  ;;  %v369_v5 = vld [vmem:[%s2220_s7 + $0x18] sm:$0xff]  ;;  %s2257_s11 = scalar_lea.vmem %s2811_s0, %s1821_s8  ;;  %s2263_s14 = scalar_lea.vmem %s2812_s1, %s2207_s25 }
  0x12   : > { %544 = vperm.xlu1 %1913, %v382_v1   ;;  %v366_v2 = vld [vmem:[%s2220_s7] sm:$0xff]  ;;  %v367_v4 = vld [vmem:[%s2220_s7 + $0x8] sm:$0xff]  ;;  %v368_v6 = vld [vmem:[%s2220_s7 + $0x10] sm:$0xff]  ;;  %s2141_s8 = smov 127   ;;  %s1825_s17 = sshll.u32 %s2831_s21, 4 }
  0x13   : > { %432 = vperm.xlu0 %1912, %v366_v2   ;;  %v385_v7 = vld [vmem:[%s2213_s28 + $0x18] sm:$0xff]  ;;  %v384_v8 = vld [vmem:[%s2213_s28 + $0x10] sm:$0xff]  ;;  %v371_v9 = vld [vmem:[%s2220_s7 + $0x28] sm:$0xff]  ;;  %s363_s20 = scalar_lea.vmem %s2817_s6, %s1825_s17 }
  0x14   : > { %v370_v10 = vld [vmem:[%s2220_s7 + $0x20] sm:$0xff]  ;;  %v387_v11 = vld [vmem:[%s2213_s28 + $0x28] sm:$0xff]  ;;  %v373_v13 = vld [vmem:[%s2220_s7 + $0x38] sm:$0xff] }
  0x15   : > { %v386_v12 = vld [vmem:[%s2213_s28 + $0x20] sm:$0xff]  ;;  %v372_v14 = vld [vmem:[%s2220_s7 + $0x30] sm:$0xff]  ;;  %v389_v15 = vld [vmem:[%s2213_s28 + $0x38] sm:$0xff] }
  0x16   : > { %549 = vperm.xlu1 %1913, %v383_v3   ;;  %v388_v16 = vld [vmem:[%s2213_s28 + $0x30] sm:$0xff]  ;;  %v375_v17 = vld [vmem:[%s2220_s7 + $0x48] sm:$0xff]  ;;  %v374_v18 = vld [vmem:[%s2220_s7 + $0x40] sm:$0xff] }
  0x17   : > { %437 = vperm.xlu0 %1912, %v367_v4   ;;  %v391_v19 = vld [vmem:[%s2213_s28 + $0x48] sm:$0xff]  ;;  %v390_v20 = vld [vmem:[%s2213_s28 + $0x40] sm:$0xff]  ;;  %v377_v21 = vld [vmem:[%s2220_s7 + $0x58] sm:$0xff] }
  0x18   : > { %v376_v22 = vld [vmem:[%s2220_s7 + $0x50] sm:$0xff]  ;;  %v393_v23 = vld [vmem:[%s2213_s28 + $0x58] sm:$0xff]  ;;  %v379_v25 = vld [vmem:[%s2220_s7 + $0x68] sm:$0xff] }
  0x19   : > { %v392_v24 = vld [vmem:[%s2213_s28 + $0x50] sm:$0xff]  ;;  %v378_v26 = vld [vmem:[%s2220_s7 + $0x60] sm:$0xff]  ;;  %v395_v27 = vld [vmem:[%s2213_s28 + $0x68] sm:$0xff] }
  0x1a   : > { %447 = vperm.xlu1 %1913, %v369_v5   ;;  %v394_v28 = vld [vmem:[%s2213_s28 + $0x60] sm:$0xff]  ;;  %v381_v29 = vld [vmem:[%s2220_s7 + $0x78] sm:$0xff]  ;;  %v380_v30 = vld [vmem:[%s2220_s7 + $0x70] sm:$0xff]  ;;  %s2140_s7 = smov 97  }
  0x1b   : > { %442 = vperm.xlu0 %1912, %v368_v6   ;;  %v397_v31 = vld [vmem:[%s2213_s28 + $0x78] sm:$0xff]  ;;  %v396_v32 = vld [vmem:[%s2213_s28 + $0x70] sm:$0xff]  ;;  %v398_v33 = vld [vmem:[%s2257_s11] sm:$0xff] }
  0x1c   : > { %v399_v34 = vld [vmem:[%s2257_s11 + $0x8] sm:$0xff]  ;;  %v894_v35 = vld [vmem:[%s2263_s14] sm:$0xff]  ;;  %v400_v41 = vld [vmem:[%s2257_s11 + $0x10] sm:$0xff] }
  0x1d   : > { %v401_v46 = vld [vmem:[%s2257_s11 + $0x18] sm:$0xff]  ;;  %v895_v47 = vld [vmem:[%s2263_s14 + $0x8] sm:$0xff]  ;;  %v404_v55 = vld [vmem:[%s2257_s11 + $0x30] sm:$0xff] }
  0x1e   : > { %559 = vperm.xlu1 %1913, %v385_v7   ;;  %v405_v58 = vld [vmem:[%s2257_s11 + $0x38] sm:$0xff]  ;;  %v402_v63 = vld [vmem:[%s2257_s11 + $0x20] sm:$0xff]  ;;  %v896_v1 = vld [vmem:[%s2263_s14 + $0x10] sm:$0xff] }
  0x1f   : > { %554 = vperm.xlu0 %1912, %v384_v8   ;;  %v897_v59 = vld [vmem:[%s2263_s14 + $0x18] sm:$0xff]  ;;  %v403_v8 = vld [vmem:[%s2257_s11 + $0x28] sm:$0xff] }
  0x22   : > { %457 = vperm.xlu1 %1913, %v371_v9  }
  0x23   : > { %452 = vperm.xlu0 %1912, %v370_v10  }
  0x26   : > { %569 = vperm.xlu1 %1913, %v387_v11  }
  0x27   : > { %564 = vperm.xlu0 %1912, %v386_v12  }
  0x2a   : > { %467 = vperm.xlu1 %1913, %v373_v13  }
  0x2b   : > { %462 = vperm.xlu0 %1912, %v372_v14  }
  0x2e   : > { %579 = vperm.xlu1 %1913, %v389_v15  }
  0x2f   : > { %574 = vperm.xlu0 %1912, %v388_v16  }
  0x32   : > { %477 = vperm.xlu1 %1913, %v375_v17  }
  0x33   : > { %472 = vperm.xlu0 %1912, %v374_v18  }
  0x36   : > { %589 = vperm.xlu1 %1913, %v391_v19  }
  0x37   : > { %584 = vperm.xlu0 %1912, %v390_v20  }
  0x3a   : > { %487 = vperm.xlu1 %1913, %v377_v21  }
  0x3b   : > { %482 = vperm.xlu0 %1912, %v376_v22  }
  0x3e   : > { %599 = vperm.xlu1 %1913, %v393_v23  }
  0x3f   : > { %594 = vperm.xlu0 %1912, %v392_v24  }
  0x42   : > { %497 = vperm.xlu1 %1913, %v379_v25   ;;  %v408_v25 = vld [vmem:[%s2257_s11 + $0x50] sm:$0xff] }
  0x43   : > { %492 = vperm.xlu0 %1912, %v378_v26   ;;  %v899_v26 = vld [vmem:[%s2263_s14 + $0x28] sm:$0xff] }
  0x46   : > { %609 = vperm.xlu1 %1913, %v395_v27  }
  0x47   : > { %604 = vperm.xlu0 %1912, %v394_v28  }
  0x4a   : > { %507 = vperm.xlu1 %1913, %v381_v29  }
  0x4b   : > { %502 = vperm.xlu0 %1912, %v380_v30  }
  0x4e   : > { %619 = vperm.xlu1 %1913, %v397_v31   ;;  %v409_v31 = vld [vmem:[%s2257_s11 + $0x58] sm:$0xff] }
  0x4f   : > { %614 = vperm.xlu0 %1912, %v396_v32  }
  0x91   : > { %v545_v36 = vpop.permute.xlu1 %544 }
  0x92   : > { %v433_v37 = vpop.permute.xlu0 %432 }
  0x93   : > { %v510_v38 = vmul.f32 %v433_v37, %v398_v33  ;;  %v511_v39 = vmul.f32 %v433_v37, %v399_v34  ;;  %v910_v40 = vmul.f32 %v894_v35, %v433_v37  ;;  %v898_v37 = vld [vmem:[%s2263_s14 + $0x20] sm:$0xff] }
  0x95   : > { %v2269_v42 = vadd.f32 %v545_v36, %v510_v38  ;;  %v2271_v43 = vadd.f32 %v545_v36, %v511_v39  ;;  %v2273_v44 = vadd.f32 %v910_v40, %v545_v36  ;;  %v550_v45 = vpop.permute.xlu1 %549 }
  0x96   : > { %v438_v48 = vpop.permute.xlu0 %437 }
  0x97   : > { %v1766_v49 = vmul.f32 -1.442695, %v2269_v42  ;;  %v1767_v50 = vmul.f32 -1.442695, %v2271_v43  ;;  %v1798_v51 = vmul.f32 -1.442695, %v2273_v44  ;;  %v512_v52 = vmul.f32 %v438_v48, %v400_v41 }
  0x98   : > { %v513_v53 = vmul.f32 %v438_v48, %v401_v46  ;;  %v911_v54 = vmul.f32 %v895_v47, %v438_v48 }
  0x99   : > { %1919 = vpow2.f32 %v1766_v49  ;;  %v2281_v56 = vadd.f32 %v550_v45, %v512_v52  ;;  %v448_v57 = vpop.permute.xlu1 %447 }
  0x9a   : > { %1921 = vpow2.f32 %v1767_v50  ;;  %v2285_v60 = vadd.f32 %v550_v45, %v513_v53  ;;  %v2287_v61 = vadd.f32 %v911_v54, %v550_v45  ;;  %v443_v62 = vpop.permute.xlu0 %442  ;;  %v516_v3 = vmul.f32 %v448_v57, %v404_v55  ;;  %v406_v50 = vld [vmem:[%s2257_s11 + $0x40] sm:$0xff]  ;;  %v407_v55 = vld [vmem:[%s2257_s11 + $0x48] sm:$0xff] }
  0x9b   : > { %1923 = vpow2.f32 %v1798_v51  ;;  %v1768_v2 = vmul.f32 -1.442695, %v2281_v56  ;;  %v517_v6 = vmul.f32 %v448_v57, %v405_v58  ;;  %v913_v7 = vmul.f32 %v897_v59, %v448_v57 }
  0x9c   : > { %v1769_v4 = vmul.f32 -1.442695, %v2285_v60  ;;  %v1799_v5 = vmul.f32 -1.442695, %v2287_v61  ;;  %v514_v9 = vmul.f32 %v443_v62, %v402_v63  ;;  %v912_v10 = vmul.f32 %v896_v1, %v443_v62  ;;  %v901_v1 = vld [vmem:[%s2263_s14 + $0x38] sm:$0xff] }
  0x9d   : > { %1925 = vpow2.f32 %v1768_v2  ;;  %v560_v11 = vpop.permute.xlu1 %559  ;;  %v515_v16 = vmul.f32 %v443_v62, %v403_v8 }
  0x9e   : > { %1927 = vpow2.f32 %v1769_v4  ;;  %v2295_v12 = vadd.f32 %v560_v11, %v516_v3  ;;  %v2297_v13 = vadd.f32 %v560_v11, %v517_v6  ;;  %v2299_v14 = vadd.f32 %v913_v7, %v560_v11  ;;  %v555_v15 = vpop.permute.xlu0 %554  ;;  %v412_v6 = vld [vmem:[%s2257_s11 + $0x70] sm:$0xff] }
  0x9f   : > { %1929 = vpow2.f32 %v1799_v5  ;;  %v2301_v17 = vadd.f32 %v555_v15, %v514_v9  ;;  %v2303_v18 = vadd.f32 %v912_v10, %v555_v15  ;;  %v2308_v22 = vadd.f32 %v555_v15, %v515_v16  ;;  %v900_v11 = vld [vmem:[%s2263_s14 + $0x30] sm:$0xff] }
  0xa0   : > { %v1772_v19 = vmul.f32 -1.442695, %v2295_v12  ;;  %v1773_v20 = vmul.f32 -1.442695, %v2297_v13  ;;  %v1801_v21 = vmul.f32 -1.442695, %v2299_v14 }
  0xa1   : > { %v1770_v23 = vmul.f32 -1.442695, %v2301_v17  ;;  %v458_v24 = vpop.permute.xlu1 %457  ;;  %v1771_v35 = vmul.f32 -1.442695, %v2308_v22  ;;  %v1800_v54 = vmul.f32 -1.442695, %v2303_v18 }
  0xa2   : > { %1931 = vpow2.f32 %v1772_v19  ;;  %v453_v27 = vpop.permute.xlu0 %452  ;;  %v520_v32 = vmul.f32 %v458_v24, %v408_v25  ;;  %v915_v36 = vmul.f32 %v899_v26, %v458_v24  ;;  %v521_v46 = vmul.f32 %v458_v24, %v409_v31  ;;  %v413_v26 = vld [vmem:[%s2257_s11 + $0x78] sm:$0xff] }
  0xa3   : > { %v1920_v28 = vpop.eup %1919  ;;  %1933 = vpow2.f32 %v1773_v20  ;;  %v914_v51 = vmul.f32 %v898_v37, %v453_v27  ;;  %v518_v3 = vmul.f32 %v453_v27, %v406_v50  ;;  %v519_v5 = vmul.f32 %v453_v27, %v407_v55  ;;  %v902_v50 = vld [vmem:[%s2263_s14 + $0x40] sm:$0xff] }
  0xa4   : > { %v1922_v29 = vpop.eup %1921  ;;  %v750_v30 = vadd.f32 1.0, %v1920_v28  ;;  %1935 = vpow2.f32 %v1801_v21 }
  0xa5   : > { %v1924_v33 = vpop.eup %1923  ;;  %v751_v34 = vadd.f32 1.0, %v1922_v29  ;;  %1937 = vpow2.f32 %v1770_v23  ;;  %v570_v38 = vpop.permute.xlu1 %569 }
  0xa6   : > { %1939 = vrcp.f32 %v750_v30  ;;  %v990_v39 = vadd.f32 1.0, %v1924_v33  ;;  %v2316_v40 = vadd.f32 %v570_v38, %v520_v32  ;;  %v565_v41 = vpop.permute.xlu0 %564  ;;  %v2318_v47 = vadd.f32 %v915_v36, %v570_v38  ;;  %v410_v32 = vld [vmem:[%s2257_s11 + $0x60] sm:$0xff]  ;;  %v411_v33 = vld [vmem:[%s2257_s11 + $0x68] sm:$0xff] }
  0xa7   : > { %v1926_v45 = vpop.eup %1925  ;;  %1941 = vrcp.f32 %v751_v34  ;;  %v2323_v57 = vadd.f32 %v570_v38, %v521_v46  ;;  %v2326_v63 = vadd.f32 %v914_v51, %v565_v41  ;;  %v2330_v9 = vadd.f32 %v565_v41, %v518_v3 }
  0xa8   : > { %v1928_v48 = vpop.eup %1927  ;;  %1943 = vrcp.f32 %v990_v39  ;;  %v752_v49 = vadd.f32 1.0, %v1926_v45  ;;  %v1776_v62 = vmul.f32 -1.442695, %v2316_v40  ;;  %v2334_v21 = vadd.f32 %v565_v41, %v519_v5  ;;  %v903_v39 = vld [vmem:[%s2263_s14 + $0x48] sm:$0xff] }
  0xa9   : > { %v1930_v52 = vpop.eup %1929  ;;  %v753_v53 = vadd.f32 1.0, %v1928_v48  ;;  %1945 = vpow2.f32 %v1771_v35  ;;  %v468_v58 = vpop.permute.xlu1 %467  ;;  %v1777_v20 = vmul.f32 -1.442695, %v2323_v57  ;;  %v1803_v31 = vmul.f32 -1.442695, %v2318_v47 }
  0xaa   : > { %1947 = vrcp.f32 %v752_v49  ;;  %v991_v59 = vadd.f32 1.0, %v1930_v52  ;;  %v463_v2 = vpop.permute.xlu0 %462  ;;  %v917_v10 = vmul.f32 %v901_v1, %v468_v58  ;;  %v524_v27 = vmul.f32 %v468_v58, %v412_v6 }
  0xab   : > { %1949 = vrcp.f32 %v753_v53  ;;  %v916_v34 = vmul.f32 %v900_v11, %v463_v2  ;;  %v1774_v36 = vmul.f32 -1.442695, %v2330_v9  ;;  %v1775_v45 = vmul.f32 -1.442695, %v2334_v21 }
  0xac   : > { %v1932_v4 = vpop.eup %1931  ;;  %1951 = vrcp.f32 %v991_v59  ;;  %v525_v46 = vmul.f32 %v468_v58, %v413_v26  ;;  %v1802_v52 = vmul.f32 -1.442695, %v2326_v63  ;;  %v522_v53 = vmul.f32 %v463_v2, %v410_v32 }
  0xad   : > { %v1934_v7 = vpop.eup %1933  ;;  %v756_v8 = vadd.f32 1.0, %v1932_v4  ;;  %1953 = vpow2.f32 %v1800_v54  ;;  %v580_v15 = vpop.permute.xlu1 %579  ;;  %v523_v54 = vmul.f32 %v463_v2, %v411_v33 }
  0xae   : > { %v1936_v16 = vpop.eup %1935  ;;  %v757_v19 = vadd.f32 1.0, %v1934_v7  ;;  %1955 = vpow2.f32 %v1776_v62  ;;  %v575_v23 = vpop.permute.xlu0 %574  ;;  %v2337_v28 = vadd.f32 %v917_v10, %v580_v15  ;;  %v2345_v37 = vadd.f32 %v580_v15, %v524_v27 }
  0xaf   : > { %v1938_v24 = vpop.eup %1937  ;;  %1957 = vrcp.f32 %v756_v8  ;;  %v993_v25 = vadd.f32 1.0, %v1936_v16  ;;  %v2351_v48 = vadd.f32 %v916_v34, %v575_v23  ;;  %v2357_v62 = vadd.f32 %v580_v15, %v525_v46  ;;  %v416_v15 = vld [vmem:[%s2257_s11 + $0x90] sm:$0xff]  ;;  %v415_v46 = vld [vmem:[%s2257_s11 + $0x88] sm:$0xff] }
  0xb0   : > { %v2339_v29 = vpop.eup %1939  ;;  %1959 = vrcp.f32 %v757_v19  ;;  %v754_v30 = vadd.f32 1.0, %v1938_v24  ;;  %v1780_v58 = vmul.f32 -1.442695, %v2345_v37  ;;  %v2360_v4 = vadd.f32 %v575_v23, %v522_v53 }
  0xb1   : > { %v1942_v35 = vpop.eup %1941  ;;  %1961 = vrcp.f32 %v993_v25  ;;  %v478_v38 = vpop.permute.xlu1 %477  ;;  %v2365_v2 = vadd.f32 %v575_v23, %v523_v54  ;;  %v1781_v24 = vmul.f32 -1.442695, %v2357_v62  ;;  %v417_v25 = vld [vmem:[%s2257_s11 + $0x98] sm:$0xff]  ;;  %v1805_v23 = vmul.f32 -1.442695, %v2337_v28 }
  0xb2   : > { %v2348_v41 = vpop.eup %1943  ;;  %1963 = vrcp.f32 %v754_v30  ;;  %v2353_v49 = vpop.permute.xlu0 %472  ;;  %v919_v1 = vmul.f32 %v903_v39, %v478_v38  ;;  %v1778_v30 = vmul.f32 -1.442695, %v2360_v4  ;;  %v847_v39 = vmul.f32 %v1942_v35, %v2271_v43  ;;  %v905_v43 = vld [vmem:[%s2263_s14 + $0x58] sm:$0xff] }
  0xb3   : > { %v1946_v51 = vpop.eup %1945  ;;  %1965 = vpow2.f32 %v1777_v20  ;;  %v918_v5 = vmul.f32 %v902_v50, %v2353_v49  ;;  %v1779_v34 = vmul.f32 -1.442695, %v2365_v2 }
  0xb4   : > { %v1948_v55 = vpop.eup %1947  ;;  %v755_v59 = vadd.f32 1.0, %v1946_v51  ;;  %1967 = vpow2.f32 %v1803_v31  ;;  %v414_v31 = vld [vmem:[%s2257_s11 + $0x80] sm:$0xff]  ;;  %v846_v51 = vmul.f32 %v2339_v29, %v2269_v42 }
  0xb5   : > { %v1950_v3 = vpop.eup %1949  ;;  %1969 = vpow2.f32 %v1774_v36  ;;  %v590_v6 = vpop.permute.xlu1 %589  ;;  %v528_v36 = vmul.f32 %v478_v38, %v416_v15 }
  0xb6   : > { %v2363_v7 = vpop.eup %1951  ;;  %1971 = vrcp.f32 %v755_v59  ;;  %v2367_v8 = vadd.f32 %v919_v1, %v590_v6  ;;  %v585_v10 = vpop.permute.xlu0 %584  ;;  %v849_v50 = vmul.f32 %v1950_v3, %v2285_v60  ;;  %v529_v59 = vmul.f32 %v478_v38, %v417_v25 }
  0xb7   : > { %v1954_v11 = vpop.eup %1953  ;;  %1973 = vpow2.f32 %v1775_v45  ;;  %v2370_v16 = vadd.f32 %v918_v5, %v585_v10  ;;  %v526_v1 = vmul.f32 %v2353_v49, %v414_v31  ;;  %v1804_v5 = vmul.f32 -1.442695, %v2351_v48 }
  0xb8   : > { %v1956_v19 = vpop.eup %1955  ;;  %v992_v20 = vadd.f32 1.0, %v1954_v11  ;;  %1975 = vpow2.f32 %v1802_v52  ;;  %v848_v52 = vmul.f32 %v1948_v55, %v2281_v56  ;;  %v879_v60 = vpack.c.bf16 %v849_v50, %v847_v39 }
  0xb9   : > { %v1958_v26 = vpop.eup %1957  ;;  %v760_v27 = vadd.f32 1.0, %v1956_v19  ;;  %1977 = vpow2.f32 %v1780_v58  ;;  %v2377_v32 = vpop.permute.xlu1 %487  ;;  %v2389_v58 = vadd.f32 %v590_v6, %v528_v36  ;;  %v527_v56 = vmul.f32 %v2353_v49, %v415_v46 }
  0xba   : > { %v1960_v33 = vpop.eup %1959  ;;  %1979 = vrcp.f32 %v992_v20  ;;  %v2386_v53 = vpop.permute.xlu0 %482  ;;  %v878_v3 = vpack.c.bf16 %v848_v52, %v846_v51  ;;  %v2394_v55 = vadd.f32 %v590_v6, %v529_v59  ;;  %v2396_v19 = vadd.f32 %v585_v10, %v526_v1  ;;  %1108 = vrot.lane.b32.xlu1 %v879_v60, %s2136_s15 }
  0xbb   : > { %v1962_v45 = vpop.eup %1961  ;;  %1981 = vrcp.f32 %v760_v27  ;;  %v921_v20 = vmul.f32 %v905_v43, %v2377_v32  ;;  %v1784_v49 = vmul.f32 -1.442695, %v2389_v58  ;;  %v2402_v6 = vadd.f32 %v585_v10, %v527_v56  ;;  %v904_v27 = vld [vmem:[%s2263_s14 + $0x50] sm:$0xff]  ;;  %v421_v10 = vld [vmem:[%s2257_s11 + $0xb8] sm:$0xff] }
  0xbc   : > { %v1964_v54 = vpop.eup %1963  ;;  %1983 = vpow2.f32 %v1781_v24  ;;  %1106 = vrot.lane.b32.xlu0 %v878_v3, %s2136_s15  ;;  %v852_v50 = vmul.f32 %v1958_v26, %v2295_v12 }
  0xbd   : > { %v1966_v35 = vpop.eup %1965  ;;  %1985 = vpow2.f32 %v1805_v23  ;;  %v600_v11 = vpop.permute.xlu1 %599  ;;  %v850_v51 = vmul.f32 %v1964_v54, %v2301_v17  ;;  %v533_v54 = vmul.f32 %v2377_v32, %v421_v10 }
  0xbe   : > { %v1968_v42 = vpop.eup %1967  ;;  %v761_v29 = vadd.f32 1.0, %v1966_v35  ;;  %1987 = vpow2.f32 %v1778_v30  ;;  %v853_v30 = vmul.f32 %v1960_v33, %v2297_v13  ;;  %v2408_v36 = vadd.f32 %v921_v20, %v600_v11  ;;  %v2410_v39 = vpop.permute.xlu0 %594 }
  0xbf   : > { %v1970_v38 = vpop.eup %1969  ;;  %v995_v15 = vadd.f32 1.0, %v1968_v42  ;;  %1989 = vpow2.f32 %v1779_v34  ;;  %v420_v34 = vld [vmem:[%s2257_s11 + $0xb0] sm:$0xff]  ;;  %v1785_v13 = vmul.f32 -1.442695, %v2394_v55  ;;  %v1041_v35 = vmul.f32 %v1962_v45, %v2299_v14  ;;  %v418_v45 = vld [vmem:[%s2257_s11 + $0xa0] sm:$0xff] }
  0xc0   : > { %v1972_v24 = vpop.eup %1971  ;;  %1991 = vrcp.f32 %v761_v29  ;;  %v758_v25 = vadd.f32 1.0, %v1970_v38  ;;  %v532_v17 = vmul.f32 %v2377_v32, %v420_v34  ;;  %v1807_v42 = vmul.f32 -1.442695, %v2367_v8 }
  0xc1   : > { %v1974_v23 = vpop.eup %1973  ;;  %v851_v31 = vmul.f32 %v1972_v24, %v2308_v22  ;;  %1993 = vrcp.f32 %v995_v15  ;;  %v920_v22 = vmul.f32 %v904_v27, %v2386_v53  ;;  %v2417_v33 = vpop.permute.xlu1 %497  ;;  %v1782_v14 = vmul.f32 -1.442695, %v2396_v19  ;;  %v419_v15 = vld [vmem:[%s2257_s11 + $0xa8] sm:$0xff] }
  0xc2   : > { %v1976_v46 = vpop.eup %1975  ;;  %v759_v52 = vadd.f32 1.0, %v1974_v23  ;;  %1995 = vrcp.f32 %v758_v25  ;;  %v880_v29 = vpack.c.bf16 %v852_v50, %v850_v51  ;;  %v2431_v20 = vadd.f32 %v600_v11, %v532_v17  ;;  %v907_v24 = vld [vmem:[%s2263_s14 + $0x68] sm:$0xff]  ;;  %v2437_v25 = vpop.permute.xlu0 %492 }
  0xc3   : > { %v1978_v59 = vpop.eup %1977  ;;  %v994_v1 = vadd.f32 1.0, %v1976_v46  ;;  %1997 = vpow2.f32 %v1804_v5  ;;  %v2425_v5 = vadd.f32 %v920_v22, %v2410_v39  ;;  %v881_v60 = vpack.c.bf16 %v853_v30, %v851_v31 }
  0xc4   : > { %v2419_v43 = vpop.eup %1979  ;;  %1999 = vrcp.f32 %v759_v52  ;;  %v764_v12 = vadd.f32 1.0, %v1978_v59  ;;  %v2433_v32 = vadd.f32 %v600_v11, %v533_v54  ;;  %v1783_v30 = vmul.f32 -1.442695, %v2402_v6  ;;  %1110 = vrot.lane.b32.xlu0 %v880_v29, %s2136_s15 }
  0xc5   : > { %v1982_v26 = vpop.eup %1981  ;;  %2001 = vrcp.f32 %v994_v1  ;;  %1112 = vrot.lane.b32.xlu1 %v881_v60, %s2136_s15  ;;  %v1806_v31 = vmul.f32 -1.442695, %v2370_v16  ;;  %v2442_v34 = vmul.f32 0.0, %v1041_v35  ;;  %v530_v46 = vmul.f32 %v2386_v53, %v418_v45  ;;  %v610_v50 = vpop.permute.xlu1 %609 }
  0xc6   : > { %v1984_v3 = vpop.eup %1983  ;;  %2003 = vrcp.f32 %v764_v12  ;;  %v531_v10 = vmul.f32 %v2386_v53, %v419_v15  ;;  %v923_v59 = vmul.f32 %v907_v24, %v2417_v33  ;;  %v1789_v22 = vmul.f32 -1.442695, %v2433_v32  ;;  %v906_v12 = vld [vmem:[%s2263_s14 + $0x60] sm:$0xff]  ;;  %v424_v53 = vld [vmem:[%s2257_s11 + $0xd0] sm:$0xff] }
  0xc7   : > { %v1986_v56 = vpop.eup %1985  ;;  %v765_v38 = vadd.f32 1.0, %v1984_v3  ;;  %2005 = vpow2.f32 %v1784_v49  ;;  %v2450_v35 = vadd.f32 %v2410_v39, %v530_v46  ;;  %v856_v54 = vmul.f32 %v1982_v26, %v2316_v40  ;;  %v425_v3 = vld [vmem:[%s2257_s11 + $0xd8] sm:$0xff]  ;;  %v422_v24 = vld [vmem:[%s2257_s11 + $0xc0] sm:$0xff] }
  0xc8   : > { %v1988_v27 = vpop.eup %1987  ;;  %v997_v23 = vadd.f32 1.0, %v1986_v56  ;;  %2007 = vpow2.f32 %v1785_v13  ;;  %v1788_v13 = vmul.f32 -1.442695, %v2431_v20  ;;  %v1809_v60 = vmul.f32 -1.442695, %v2408_v36 }
  0xc9   : > { %v1990_v49 = vpop.eup %1989  ;;  %2009 = vrcp.f32 %v765_v38  ;;  %v762_v11 = vadd.f32 1.0, %v1988_v27  ;;  %v2457_v45 = vadd.f32 %v923_v59, %v610_v50  ;;  %v2462_v15 = vadd.f32 %v2410_v39, %v531_v10  ;;  %v605_v27 = vpop.permute.xlu0 %604  ;;  %v423_v39 = vld [vmem:[%s2257_s11 + $0xc8] sm:$0xff] }
  0xca   : > { %v1992_v51 = vpop.eup %1991  ;;  %2011 = vrcp.f32 %v997_v23  ;;  %v763_v52 = vadd.f32 1.0, %v1990_v49  ;;  %v1040_v26 = vmul.f32 %v2419_v43, %v2303_v18  ;;  %v922_v49 = vmul.f32 %v906_v12, %v2437_v25 }
  0xcb   : > { %v1994_v1 = vpop.eup %1993  ;;  %2013 = vrcp.f32 %v762_v11  ;;  %v857_v56 = vmul.f32 %v1992_v51, %v2323_v57  ;;  %v534_v51 = vmul.f32 %v2437_v25, %v422_v24 }
  0xcc   : > { %v1996_v17 = vpop.eup %1995  ;;  %2015 = vrcp.f32 %v763_v52  ;;  %v2473_v52 = vadd.f32 %v922_v49, %v605_v27  ;;  %v1043_v59 = vmul.f32 %v1994_v1, %v2318_v47  ;;  %v1787_v47 = vmul.f32 -1.442695, %v2462_v15 }
  0xcd   : > { %v1998_v29 = vpop.eup %1997  ;;  %v854_v38 = vmul.f32 %v1996_v17, %v2330_v9  ;;  %2017 = vpow2.f32 %v1807_v42  ;;  %v536_v9 = vmul.f32 %v2417_v33, %v424_v53  ;;  %v537_v42 = vmul.f32 %v2417_v33, %v425_v3 }
  0xce   : > { %v2000_v40 = vpop.eup %1999  ;;  %v996_v23 = vadd.f32 1.0, %v1998_v29  ;;  %2019 = vpow2.f32 %v1782_v14  ;;  %v535_v33 = vmul.f32 %v2437_v25, %v423_v39  ;;  %v2486_v3 = vmul.f32 0.0, %v1040_v26 }
  0xcf   : > { %v2002_v11 = vpop.eup %2001  ;;  %v855_v57 = vmul.f32 %v2000_v40, %v2334_v21  ;;  %2021 = vpow2.f32 %v1783_v30  ;;  %v882_v18 = vpack.c.bf16 %v856_v54, %v854_v38  ;;  %v2475_v14 = vadd.f32 %v610_v50, %v536_v9 }
  0xd0   : > { %v2004_v46 = vpop.eup %2003  ;;  %2023 = vrcp.f32 %v996_v23  ;;  %v2477_v10 = vadd.f32 %v610_v50, %v537_v42  ;;  %v1786_v54 = vmul.f32 -1.442695, %v2450_v35  ;;  %v2489_v1 = vadd.f32 %v605_v27, %v535_v33 }
  0xd1   : > { %v2006_v43 = vpop.eup %2005  ;;  %2025 = vpow2.f32 %v1806_v31  ;;  %v883_v21 = vpack.c.bf16 %v857_v56, %v855_v57  ;;  %1114 = vrot.lane.b32.xlu0 %v882_v18, %s2136_s15  ;;  %v2483_v31 = vadd.f32 %v605_v27, %v534_v51  ;;  %v2496_v38 = vmul.f32 0.0, %v1043_v59  ;;  %v508_v57 = vpop.permute.xlu1 %507  ;;  %v429_v18 = vld [vmem:[%s2257_s11 + $0xf8] sm:$0xff] }
  0xd2   : > { %v2008_v30 = vpop.eup %2007  ;;  %v768_v12 = vadd.f32 1.0, %v2006_v43  ;;  %2027 = vpow2.f32 %v1788_v13  ;;  %v1808_v13 = vmul.f32 -1.442695, %v2425_v5  ;;  %v2494_v29 = vmul.f32 -1.442695, %v2477_v10  ;;  %v909_v43 = vld [vmem:[%s2263_s14 + $0x78] sm:$0xff] }
  0xd3   : > { %v2010_v17 = vpop.eup %2009  ;;  %v769_v53 = vadd.f32 1.0, %v2008_v30  ;;  %2029 = vpow2.f32 %v1789_v22  ;;  %1116 = vrot.lane.b32.xlu1 %v883_v21, %s2136_s15  ;;  %v1792_v22 = vmul.f32 -1.442695, %v2475_v14  ;;  %v1042_v24 = vmul.f32 %v2002_v11, %v2326_v63  ;;  %v428_v11 = vld [vmem:[%s2257_s11 + $0xf0] sm:$0xff] }
  0xd4   : > { %v2012_v50 = vpop.eup %2011  ;;  %2031 = vrcp.f32 %v768_v12  ;;  %v2500_v40 = vmul.f32 -1.442695, %v2457_v45  ;;  %v861_v26 = vmul.f32 %v2010_v17, %v2357_v62  ;;  %v2505_v49 = vmul.f32 -1.442695, %v2483_v31 }
  0xd5   : > { %v2014_v25 = vpop.eup %2013  ;;  %2033 = vrcp.f32 %v769_v53  ;;  %v860_v42 = vmul.f32 %v2004_v46, %v2345_v37  ;;  %v1045_v62 = vmul.f32 %v2012_v50, %v2337_v28  ;;  %v1070_v30 = vmul.f32 0.0, %v1042_v24  ;;  %v503_v50 = vpop.permute.xlu0 %502 }
  0xd6   : > { %v2016_v56 = vpop.eup %2015  ;;  %2035 = vpow2.f32 %v1809_v60  ;;  %v2509_v60 = vmul.f32 -1.442695, %v2489_v1  ;;  %v2517_v46 = vmul.f32 -1.442695, %v2473_v52  ;;  %v540_v33 = vmul.f32 %v508_v57, %v428_v11  ;;  %v620_v24 = vpop.permute.xlu1 %619 }
  0xd7   : > { %v2018_v27 = vpop.eup %2017  ;;  %v859_v23 = vmul.f32 %v2016_v56, %v2365_v2  ;;  %2037 = vpow2.f32 %v1786_v54  ;;  %v858_v2 = vmul.f32 %v2014_v25, %v2360_v4  ;;  %v541_v53 = vmul.f32 %v508_v57, %v429_v18 }
  0xd8   : > { %v2020_v9 = vpop.eup %2019  ;;  %v999_v63 = vadd.f32 1.0, %v2018_v27  ;;  %2039 = vpow2.f32 %v1787_v47  ;;  %v925_v54 = vmul.f32 %v909_v43, %v508_v57  ;;  %v426_v47 = vld [vmem:[%s2257_s11 + $0xe0] sm:$0xff]  ;;  %v2137_v57 = vmov 0.0  }
  0xd9   : > { %v2022_v39 = vpop.eup %2021  ;;  %v766_v51 = vadd.f32 1.0, %v2020_v9  ;;  %2041 = vpow2.f32 %v1808_v13  ;;  %v885_v28 = vpack.c.bf16 %v861_v26, %v859_v23  ;;  %v1073_v13 = vmul.f32 0.0, %v1045_v62  ;;  %1839 = vmatprep.subr.bf16.mxu1 %v2137_v57  ;;  %1855 = vmatprep.mubr.msk.bf16.mxu1 %vm2138_vm0, %v2137_v57 }
  0xda   : > { %v2024_v21 = vpop.eup %2023  ;;  %2043 = vrcp.f32 %v999_v63  ;;  %v767_v37 = vadd.f32 1.0, %v2022_v39  ;;  %v884_v27 = vpack.c.bf16 %v860_v42, %v858_v2  ;;  %v538_v23 = vmul.f32 %v503_v50, %v426_v47 }
  0xdb   : > { %v2026_v59 = vpop.eup %2025  ;;  %v1044_v12 = vmul.f32 %v2024_v21, %v2351_v48  ;;  %2045 = vrcp.f32 %v766_v51  ;;  %1120 = vrot.lane.b32.xlu1 %v885_v28, %s2136_s15  ;;  %v1039_v42 = vmul.f32 %v2363_v7, %v2287_v61  ;;  %v2528_v39 = vadd.f32 %v620_v24, %v540_v33  ;;  %v908_v7 = vld [vmem:[%s2263_s14 + $0x70] sm:$0xff]  ;;  %s2145_s14 = smov 65  }
  0xdc   : > { %v2028_v17 = vpop.eup %2027  ;;  %2047 = vrcp.f32 %v767_v37  ;;  %v998_v4 = vadd.f32 1.0, %v2026_v59  ;;  %1118 = vrot.lane.b32.xlu0 %v884_v27, %s2136_s15  ;;  %v2532_v62 = vpack.c.bf16 %v2442_v34, %v2486_v3  ;;  %v2535_v2 = vpack.c.bf16 %v2496_v38, %v1070_v30 }
  0xdd   : > { %v2030_v25 = vpop.eup %2029  ;;  %v772_v56 = vadd.f32 1.0, %v2028_v17  ;;  %2049 = vpow2.f32 %v1792_v22  ;;  %v1072_v48 = vmul.f32 0.0, %v1044_v12  ;;  %v1038_v22 = vmul.f32 %v2348_v41, %v2273_v44  ;;  %v427_v44 = vld [vmem:[%s2257_s11 + $0xe8] sm:$0xff]  ;;  %v615_v17 = vpop.permute.xlu0 %614  ;;  %s2144_s11 = smov 111  }
  0xde   : > { %v2032_v9 = vpop.eup %2031  ;;  %2051 = vrcp.f32 %v998_v4  ;;  %v773_v63 = vadd.f32 1.0, %v2030_v25  ;;  %v1067_v43 = vmul.f32 0.0, %v1039_v42  ;;  %v2541_v37 = vadd.f32 %v620_v24, %v541_v53 }
  0xdf   : > { %v2034_v26 = vpop.eup %2033  ;;  %2053 = vrcp.f32 %v772_v56  ;;  %v1066_v41 = vmul.f32 0.0, %v1038_v22  ;;  %v2543_v59 = vpack.c.bf16 %v1073_v13, %v1072_v48  ;;  %v2545_v38 = vadd.f32 %v925_v54, %v620_v24 }
  0xe0   : > { %v2036_v11 = vpop.eup %2035  ;;  %2055 = vrcp.f32 %v773_v63  ;;  %v864_v12 = vmul.f32 %v2032_v9, %v2389_v58  ;;  %v539_v28 = vmul.f32 %v503_v50, %v427_v44  ;;  %v865_v4 = vmul.f32 %v2034_v26, %v2394_v55 }
  0xe1   : > { %v2038_v51 = vpop.eup %2037  ;;  %v1001_v18 = vadd.f32 1.0, %v2036_v11  ;;  %2057 = vpow2.f32 %v2494_v29  ;;  %v2547_v30 = vpack.c.bf16 %v1067_v43, %v1066_v41  ;;  %v924_v47 = vmul.f32 %v908_v7, %v503_v50 }
  0xe2   : > { %v2040_v21 = vpop.eup %2039  ;;  %v770_v61 = vadd.f32 1.0, %v2038_v51  ;;  %2059 = vpow2.f32 %v2500_v40  ;;  %v1796_v13 = vmul.f32 -1.442695, %v2528_v39  ;;  %v1797_v56 = vmul.f32 -1.442695, %v2541_v37 }
  0xe3   : > { %v2042_v34 = vpop.eup %2041  ;;  %2061 = vrcp.f32 %v1001_v18  ;;  %v771_v3 = vadd.f32 1.0, %v2040_v21  ;;  %v1813_v27 = vmul.f32 -1.442695, %v2545_v38  ;;  %v2558_v55 = vadd.f32 %v615_v17, %v538_v23 }
  0xe4   : > { %v2044_v29 = vpop.eup %2043  ;;  %2063 = vrcp.f32 %v770_v61  ;;  %v1000_v33 = vadd.f32 1.0, %v2042_v34  ;;  %v2561_v50 = vadd.f32 %v615_v17, %v539_v28 }
  0xe5   : > { %v2046_v40 = vpop.eup %2045  ;;  %v1047_v53 = vmul.f32 %v2044_v29, %v2367_v8  ;;  %2065 = vrcp.f32 %v771_v3  ;;  %v1794_v51 = vmul.f32 -1.442695, %v2558_v55 }
  0xe6   : > { %v2048_v25 = vpop.eup %2047  ;;  %v862_v54 = vmul.f32 %v2046_v40, %v2396_v19  ;;  %2067 = vrcp.f32 %v1000_v33 }
  0xe7   : > { %v2050_v58 = vpop.eup %2049  ;;  %v863_v24 = vmul.f32 %v2048_v25, %v2402_v6  ;;  %2069 = vpow2.f32 %v2505_v49  ;;  %v1075_v63 = vmul.f32 0.0, %v1047_v53  ;;  %v2565_v49 = vadd.f32 %v924_v47, %v615_v17 }
  0xe8   : > { %v2052_v8 = vpop.eup %2051  ;;  %v776_v9 = vadd.f32 1.0, %v2050_v58  ;;  %2071 = vpow2.f32 %v2509_v60  ;;  %v886_v19 = vpack.c.bf16 %v864_v12, %v862_v54 }
  0xe9   : > { %v2054_v48 = vpop.eup %2053  ;;  %v1046_v26 = vmul.f32 %v2052_v8, %v2370_v16  ;;  %2073 = vpow2.f32 %v2517_v46  ;;  %v887_v6 = vpack.c.bf16 %v865_v4, %v863_v24  ;;  %v1795_v16 = vmul.f32 -1.442695, %v2561_v50 }
  0xea   : > { %v2056_v22 = vpop.eup %2055  ;;  %2075 = vrcp.f32 %v776_v9  ;;  %1122 = vrot.lane.b32.xlu0 %v886_v19, %s2136_s15  ;;  %v868_v18 = vmul.f32 %v2054_v48, %v2431_v20  ;;  %v1812_v7 = vmul.f32 -1.442695, %v2565_v49 }
  0xeb   : > { %v2058_v23 = vpop.eup %2057  ;;  %v1074_v42 = vmul.f32 0.0, %v1046_v26  ;;  %2077 = vpow2.f32 %v1796_v13  ;;  %1124 = vrot.lane.b32.xlu1 %v887_v6, %s2136_s15  ;;  %v869_v21 = vmul.f32 %v2056_v22, %v2433_v32 }
  0xec   : > { %v2060_v60 = vpop.eup %2059  ;;  %v777_v11 = vadd.f32 1.0, %v2058_v23  ;;  %2079 = vpow2.f32 %v1797_v56 }
  0xed   : > { %v2062_v46 = vpop.eup %2061  ;;  %v1003_v44 = vadd.f32 1.0, %v2060_v60  ;;  %2081 = vpow2.f32 %v1813_v27  ;;  %v2572_v41 = vpack.c.bf16 %v1075_v63, %v1074_v42 }
  0xee   : > { %v2064_v43 = vpop.eup %2063  ;;  %v1049_v61 = vmul.f32 %v2062_v46, %v2408_v36  ;;  %2083 = vrcp.f32 %v777_v11 }
  0xef   : > { %v2066_v34 = vpop.eup %2065  ;;  %v866_v3 = vmul.f32 %v2064_v43, %v2450_v35  ;;  %2085 = vrcp.f32 %v1003_v44 }
  0xf0   : > { %v2068_v29 = vpop.eup %2067  ;;  %v867_v12 = vmul.f32 %v2066_v34, %v2462_v15  ;;  %2087 = vpow2.f32 %v1794_v51  ;;  %v1077_v33 = vmul.f32 0.0, %v1049_v61 }
  0xf1   : > { %v2070_v20 = vpop.eup %2069  ;;  %v1048_v28 = vmul.f32 %v2068_v29, %v2425_v5  ;;  %2089 = vpow2.f32 %v1795_v16  ;;  %v888_v17 = vpack.c.bf16 %v868_v18, %v866_v3 }
  0xf2   : > { %v2072_v32 = vpop.eup %2071  ;;  %v774_v40 = vadd.f32 1.0, %v2070_v20  ;;  %2091 = vpow2.f32 %v1812_v7  ;;  %v889_v36 = vpack.c.bf16 %v869_v21, %v867_v12 }
  0xf3   : > { %v2074_v4 = vpop.eup %2073  ;;  %v1076_v53 = vmul.f32 0.0, %v1048_v28  ;;  %v775_v47 = vadd.f32 1.0, %v2072_v32  ;;  %1126 = vrot.lane.b32.xlu0 %v888_v17, %s2136_s15 }
  0xf4   : > { %v2076_v35 = vpop.eup %2075  ;;  %2093 = vrcp.f32 %v774_v40  ;;  %v1002_v25 = vadd.f32 1.0, %v2074_v4  ;;  %1128 = vrot.lane.b32.xlu1 %v889_v36, %s2136_s15 }
  0xf5   : > { %v2078_v15 = vpop.eup %2077  ;;  %2095 = vrcp.f32 %v775_v47  ;;  %v2582_v54 = vpack.c.bf16 %v1077_v33, %v1076_v53  ;;  %v872_v6 = vmul.f32 %v2076_v35, %v2475_v14 }
  0xf6   : > { %v2080_v5 = vpop.eup %2079  ;;  %2097 = vrcp.f32 %v1002_v25  ;;  %v780_v13 = vadd.f32 1.0, %v2078_v15 }
  0xf7   : > { %v2082_v56 = vpop.eup %2081  ;;  %v781_v58 = vadd.f32 1.0, %v2080_v5 }
  0xf8   : > { %v2084_v24 = vpop.eup %2083  ;;  %2099 = vrcp.f32 %v780_v13  ;;  %v1005_v27 = vadd.f32 1.0, %v2082_v56 }
  0xf9   : > { %v2086_v8 = vpop.eup %2085  ;;  %2101 = vrcp.f32 %v781_v58  ;;  %v873_v60 = vmul.f32 %v2084_v24, %v2477_v10 }
  0xfa   : > { %v2088_v9 = vpop.eup %2087  ;;  %2103 = vrcp.f32 %v1005_v27  ;;  %v1051_v22 = vmul.f32 %v2086_v8, %v2457_v45 }
  0xfb   : > { %v2090_v19 = vpop.eup %2089  ;;  %v778_v48 = vadd.f32 1.0, %v2088_v9 }
  0xfc   : > { %v2092_v63 = vpop.eup %2091  ;;  %v779_v26 = vadd.f32 1.0, %v2090_v19  ;;  %v1079_v18 = vmul.f32 0.0, %v1051_v22 }
  0xfd   : > { %2105 = vrcp.f32 %v778_v48  ;;  %v1004_v23 = vadd.f32 1.0, %v2092_v63 }
  0xfe   : > { %v2094_v42 = vpop.eup %2093  ;;  %2107 = vrcp.f32 %v779_v26 }
  0xff   : > { %v2096_v11 = vpop.eup %2095  ;;  %v870_v51 = vmul.f32 %v2094_v42, %v2483_v31  ;;  %2109 = vrcp.f32 %v1004_v23 }
 0x100   : > { %v2098_v16 = vpop.eup %2097  ;;  %v871_v46 = vmul.f32 %v2096_v11, %v2489_v1 }
 0x101   : > { %v1050_v44 = vmul.f32 %v2098_v16, %v2473_v52  ;;  %v890_v43 = vpack.c.bf16 %v872_v6, %v870_v51 }
 0x102   : > { %v2100_v14 = vpop.eup %2099  ;;  %v891_v21 = vpack.c.bf16 %v873_v60, %v871_v46 }
 0x103   : > { %v2102_v45 = vpop.eup %2101  ;;  %v1078_v61 = vmul.f32 0.0, %v1050_v44  ;;  %1130 = vrot.lane.b32.xlu0 %v890_v43, %s2136_s15  ;;  %v876_v31 = vmul.f32 %v2100_v14, %v2528_v39  ;;  %v1914_v44 = vld [vmem:[%s2815_s4] sm:$0xff]   ;;  %v1915_v43 = vld [vmem:[%s2815_s4 + $0x8] sm:$0xff]   ;;  %v1916_v14 = vld [vmem:[%s2815_s4 + $0x10] sm:$0xff]  }
 0x104   : > { %v2104_v7 = vpop.eup %2103  ;;  %1132 = vrot.lane.b32.xlu1 %v891_v21, %s2136_s15  ;;  %v877_v3 = vmul.f32 %v2102_v45, %v2541_v37  ;;  %v1917_v21 = vld [vmem:[%s2815_s4 + $0x18] sm:$0xff]   ;;  %v1918_v45 = vld [vmem:[%s2815_s4 + $0x20] ss:$0 sps:$4 sm:$0xff]  }
 0x105   : > { %v2592_v10 = vpack.c.bf16 %v1079_v18, %v1078_v61  ;;  %v1053_v34 = vmul.f32 %v2104_v7, %v2545_v38 }
 0x107   : > { %v2106_v1 = vpop.eup %2105  ;;  %v1081_v33 = vmul.f32 0.0, %v1053_v34 }
 0x108   : > { %v2108_v52 = vpop.eup %2107  ;;  %v874_v29 = vmul.f32 %v2106_v1, %v2558_v55 }
 0x109   : > { %v2110_v12 = vpop.eup %2109  ;;  %v875_v20 = vmul.f32 %v2108_v52, %v2561_v50 }
 0x10a   : > { %v1052_v28 = vmul.f32 %v2110_v12, %v2565_v49  ;;  %v892_v17 = vpack.c.bf16 %v876_v31, %v874_v29 }
 0x10b   : > { %v893_v32 = vpack.c.bf16 %v877_v3, %v875_v20 }
 0x10c   : > { %v1080_v40 = vmul.f32 0.0, %v1052_v28  ;;  %1134 = vrot.lane.b32.xlu0 %v892_v17, %s2136_s15 }
 0x10d   : > { %1136 = vrot.lane.b32.xlu1 %v893_v32, %s2136_s15  ;;  %s2146_s15 = smov 96  }
 0x10e   : > { %v2602_v39 = vpack.c.bf16 %v1081_v33, %v1080_v40 }
 0x12c   : > { %v1109_v37 = vpop.permute.xlu1 %1108 }
 0x12d   : > { %v1189_v50 = vsel %vm1138_vm1, %v1109_v37, %v2547_v30 }
 0x12e   : > { %v1107_v38 = vpop.permute.xlu0 %1106  ;;  %1840 = vmatpush3.bf16.msra.mxu1 %v1189_v50 }
 0x12f   : > { %v1139_v55 = vsel %vm1138_vm1, %v1107_v38, %v1109_v37  ;;  %v1158_v49 = vsel %vm1138_vm1, %v2547_v30, %v1107_v38  ;;  %1841 = vmatprep.subr.bf16.mxu1 %v2137_v57 }
 0x130   : > { %1249 = vmatprep.subr.bf16.mxu0 %v1139_v55 }
 0x131   : > { %1250 = vmatpush1.bf16.msra.mxu0 %v1158_v49 }
 0x136   : > { %v1111_v4 = vpop.permute.xlu0 %1110 }
 0x137   : > { %v1113_v36 = vpop.permute.xlu1 %1112  ;;  %v1162_v35 = vsel %vm1138_vm1, %v2532_v62, %v1111_v4 }
 0x138   : > { %v1192_v53 = vsel %vm1138_vm1, %v1113_v36, %v2532_v62  ;;  %v1140_v47 = vsel %vm1138_vm1, %v1111_v4, %v1113_v36 }
 0x139   : > { %1842 = vmatpush3.bf16.msra.mxu1 %v1192_v53  ;;  %1251 = vmatprep.subr.bf16.mxu0 %v1140_v47 }
 0x13a   : > { %1843 = vmatprep.subr.bf16.mxu1 %v2137_v57  ;;  %1252 = vmatpush1.bf16.msra.mxu0 %v1162_v35 }
 0x143   : > { %v1115_v30 = vpop.permute.xlu0 %1114 }
 0x144   : > { %v1166_v15 = vsel %vm1138_vm1, %v2535_v2, %v1115_v30 }
 0x145   : > { %v1117_v25 = vpop.permute.xlu1 %1116 }
 0x146   : > { %v1141_v5 = vsel %vm1138_vm1, %v1115_v30, %v1117_v25  ;;  %v1195_v13 = vsel %vm1138_vm1, %v1117_v25, %v2535_v2 }
 0x147   : > { %1253 = vmatprep.subr.bf16.mxu0 %v1141_v5  ;;  %1844 = vmatpush3.bf16.msra.mxu1 %v1195_v13 }
 0x148   : > { %1254 = vmatpush1.bf16.msra.mxu0 %v1166_v15  ;;  %1845 = vmatprep.subr.bf16.mxu1 %v2137_v57 }
 0x14d   : > { %v1121_v62 = vpop.permute.xlu1 %1120 }
 0x14e   : > { %v1198_v56 = vsel %vm1138_vm1, %v1121_v62, %v2543_v59  ;;  %v1119_v58 = vpop.permute.xlu0 %1118 }
 0x14f   : > { %1846 = vmatpush3.bf16.msra.mxu1 %v1198_v56  ;;  %v1142_v24 = vsel %vm1138_vm1, %v1119_v58, %v1121_v62  ;;  %v1170_v27 = vsel %vm1138_vm1, %v2543_v59, %v1119_v58 }
 0x150   : > { %1847 = vmatprep.subr.bf16.mxu1 %v2137_v57  ;;  %1255 = vmatprep.subr.bf16.mxu0 %v1142_v24 }
 0x151   : > { %1256 = vmatpush1.bf16.msra.mxu0 %v1170_v27 }
 0x15c   : > { %v1123_v2 = vpop.permute.xlu0 %1122 }
 0x15d   : > { %v1125_v8 = vpop.permute.xlu1 %1124  ;;  %v1174_v9 = vsel %vm1138_vm1, %v2572_v41, %v1123_v2 }
 0x15e   : > { %v1143_v19 = vsel %vm1138_vm1, %v1123_v2, %v1125_v8  ;;  %v1201_v48 = vsel %vm1138_vm1, %v1125_v8, %v2572_v41 }
 0x15f   : > { %1257 = vmatprep.subr.bf16.mxu0 %v1143_v19  ;;  %1848 = vmatpush3.bf16.msra.mxu1 %v1201_v48 }
 0x160   : > { %1258 = vmatpush1.bf16.msra.mxu0 %v1174_v9  ;;  %1849 = vmatprep.subr.bf16.mxu1 %v2137_v57 }
 0x165   : > { %v1127_v59 = vpop.permute.xlu0 %1126 }
 0x166   : > { %v1129_v63 = vpop.permute.xlu1 %1128  ;;  %v1178_v26 = vsel %vm1138_vm1, %v2582_v54, %v1127_v59 }
 0x167   : > { %v1144_v6 = vsel %vm1138_vm1, %v1127_v59, %v1129_v63  ;;  %v1204_v22 = vsel %vm1138_vm1, %v1129_v63, %v2582_v54 }
 0x168   : > { %1259 = vmatprep.subr.bf16.mxu0 %v1144_v6  ;;  %1850 = vmatpush3.bf16.msra.mxu1 %v1204_v22 }
 0x169   : > { %1260 = vmatpush1.bf16.msra.mxu0 %v1178_v26  ;;  %1851 = vmatprep.subr.bf16.mxu1 %v2137_v57 }
 0x175   : > { %v1131_v41 = vpop.permute.xlu0 %1130 }
 0x176   : > { %v1133_v23 = vpop.permute.xlu1 %1132  ;;  %v1182_v42 = vsel %vm1138_vm1, %v2592_v10, %v1131_v41 }
 0x177   : > { %v1145_v60 = vsel %vm1138_vm1, %v1131_v41, %v1133_v23  ;;  %v1207_v11 = vsel %vm1138_vm1, %v1133_v23, %v2592_v10 }
 0x178   : > { %1261 = vmatprep.subr.bf16.mxu0 %v1145_v60  ;;  %1852 = vmatpush3.bf16.msra.mxu1 %v1207_v11 }
 0x179   : > { %1262 = vmatpush1.bf16.msra.mxu0 %v1182_v42  ;;  %1853 = vmatprep.subr.bf16.mxu1 %v2137_v57 }
 0x17e   : > { %v1135_v54 = vpop.permute.xlu0 %1134 }
 0x17f   : > { %v1137_v51 = vpop.permute.xlu1 %1136  ;;  %v1186_v16 = vsel %vm1138_vm1, %v2602_v39, %v1135_v54 }
 0x180   : > { %v1146_v46 = vsel %vm1138_vm1, %v1135_v54, %v1137_v51  ;;  %v1210_v18 = vsel %vm1138_vm1, %v1137_v51, %v2602_v39 }
 0x181   : > { %1263 = vmatprep.subr.bf16.mxu0 %v1146_v46  ;;  %1854 = vmatpush3.bf16.msra.mxu1 %v1210_v18 }
 0x182   : > { %1264 = vmatpush1.bf16.msra.mxu0 %v1186_v16  ;;  %v1609_v16 = vld [vmem:[%s2816_s5] sm:$0xff] }
 0x184   : > { %1856 = vmatmul.mubr.bf16.vlgmr.msra.gmra.mrb[0].mxu1 %v1914_v44 }
 0x185   : > { %1282 = vmatmul.mubr.bf16.vlgmr.msra.gmra.mrb[0].mxu0 %v1914_v44  ;;  %1859 = vmatprep.mubr.msk.bf16.mxu1 %vm2138_vm0, %v2137_v57 }
 0x186   : > { %1291 = vmatprep.mubr.bf16.mxu0 %v2135_v0 }
 0x18c   : > { %1860 = vmatmul.mubr.bf16.gmra.mrb[4].mxu1 %v1915_v43 }
 0x18d   : > { %1292 = vmatmul.mubr.bf16.gmra.mrb[4].mxu0 %v1915_v43  ;;  %1863 = vmatprep.mubr.msk.bf16.mxu1 %vm2138_vm0, %v2137_v57 }
 0x18e   : > { %1301 = vmatprep.mubr.bf16.mxu0 %v2135_v0 }
 0x194   : > { %1864 = vmatmul.mubr.bf16.gmra.mrb[8].mxu1 %v1916_v14 }
 0x195   : > { %1302 = vmatmul.mubr.bf16.gmra.mrb[8].mxu0 %v1916_v14  ;;  %1867 = vmatprep.mubr.msk.bf16.mxu1 %vm2138_vm0, %v2137_v57 }
 0x196   : > { %1311 = vmatprep.mubr.bf16.mxu0 %v2135_v0 }
 0x19c   : > { %1868 = vmatmul.mubr.bf16.gmra.mrb[12].mxu1 %v1917_v21 }
 0x19d   : > { %1312 = vmatmul.mubr.bf16.gmra.mrb[12].mxu0 %v1917_v21  ;;  %1871 = vmatprep.mubr.msk.bf16.mxu1 %vm2138_vm0, %v2137_v57 }
 0x19e   : > { %1321 = vmatprep.mubr.bf16.mxu0 %v2135_v0 }
 0x1a4   : > { %1872 = vmatmul.mubr.bf16.gmra.mrb[16].mxu1 %v1918_v45 }
 0x1a5   : > { %1322 = vmatmul.mubr.bf16.gmra.mrb[16].mxu0 %v1918_v45 }
 0x257   : > { %v1364_v61 = vpop.f32.mrb[0].mxu1 }
 0x258   : > { %v1283_v7 = vpop.f32.mrb[0].mxu0  ;;  %v1857_v10 = vpop.f32.mrb[1].mxu1 }
 0x259   : > { %1427 = vrot.lane.b32.xlu0 %v1283_v7, %s2139_s30  ;;  %v1285_v31 = vpop.f32.mrb[1].mxu0  ;;  %v1367_v34 = vpop.f32.mrb[2].mxu1 }
 0x25a   : > { %v2681_v1 = vpop.f32.mrb[2].mxu0  ;;  %v1858_v3 = vpop.f32.mrb[3].mxu1 }
 0x25b   : > { %v2683_v57 = vpop.f32.mrb[3].mxu0 }
 0x25f   : > { %v1371_v0 = vpop.f32.mrb[4].mxu1 }
 0x260   : > { %v1293_v52 = vpop.f32.mrb[4].mxu0  ;;  %v1861_v29 = vpop.f32.mrb[5].mxu1 }
 0x261   : > { %v1295_v12 = vpop.f32.mrb[5].mxu0  ;;  %v1374_v20 = vpop.f32.mrb[6].mxu1 }
 0x262   : > { %v1297_v33 = vpop.f32.mrb[6].mxu0  ;;  %v1862_v28 = vpop.f32.mrb[7].mxu1 }
 0x263   : > { %1481 = vrot.lane.b32.xlu1 %v1297_v33, %s2139_s30  ;;  %v1299_v17 = vpop.f32.mrb[7].mxu0  ;;  %v1060_v33 = vlaneseq }
 0x267   : > { %1430 = vrot.lane.b32.xlu1 %v1285_v31, %s2139_s30  ;;  %v2687_v32 = vpop.f32.mrb[8].mxu1 }
 0x268   : > { %v2689_v40 = vpop.f32.mrb[8].mxu0  ;;  %v1865_v39 = vpop.f32.mrb[9].mxu1 }
 0x269   : > { %v1305_v37 = vpop.f32.mrb[9].mxu0  ;;  %v1382_v38 = vpop.f32.mrb[10].mxu1 }
 0x26a   : > { %v1307_v55 = vpop.f32.mrb[10].mxu0  ;;  %v1866_v50 = vpop.f32.mrb[11].mxu1 }
 0x26b   : > { %v2691_v49 = vpop.f32.mrb[11].mxu0  ;;  %1458 = vrot.lane.b32.xlu1 %v1293_v52, %s2139_s30 }
 0x26f   : > { %v1387_v36 = vpop.f32.mrb[12].mxu1 }
 0x270   : > { %v1313_v4 = vpop.f32.mrb[12].mxu0  ;;  %v1869_v53 = vpop.f32.mrb[13].mxu1 }
 0x271   : > { %1545 = vrot.lane.b32.xlu0 %v1313_v4, %s2139_s30  ;;  %v1315_v47 = vpop.f32.mrb[13].mxu0  ;;  %v2697_v25 = vpop.f32.mrb[14].mxu1 }
 0x272   : > { %v1317_v35 = vpop.f32.mrb[14].mxu0  ;;  %v1870_v15 = vpop.f32.mrb[15].mxu1 }
 0x273   : > { %v2695_v30 = vpop.f32.mrb[15].mxu0 }
 0x277   : > { %v1395_v26 = vpop.f32.mrb[16].mxu1 }
 0x278   : > { %v2699_v5 = vpop.f32.mrb[16].mxu0  ;;  %v1873_v6 = vpop.f32.mrb[17].mxu1 }
 0x279   : > { %v2701_v13 = vpop.f32.mrb[17].mxu0  ;;  %v1398_v22 = vpop.f32.mrb[18].mxu1 }
 0x27a   : > { %v1327_v62 = vpop.f32.mrb[18].mxu0  ;;  %v1874_v41 = vpop.f32.mrb[19].mxu1 }
 0x27b   : > { %v1328_v56 = vpop.f32.mrb[19].mxu0 }
 0x2cb   : > { %v1428_v58 = vpop.permute.xlu0 %1427 }
 0x2cc   : > { %v1429_v24 = vsel %vm1426_vm2, %v1428_v58, %v1364_v61 }
 0x2cd   : > { %1432 = vrot.lane.b32.xlu0 %v1429_v24, %s2139_s30 }
 0x2d1   : > { %1484 = vrot.lane.b32.xlu0 %v1299_v17, %s2139_s30 }
 0x2d5   : > { %v1482_v27 = vpop.permute.xlu1 %1481  ;;  %1524 = vrot.lane.b32.xlu0 %v1307_v55, %s2139_s30 }
 0x2d6   : > { %v1483_v2 = vsel %vm1426_vm2, %v1482_v27, %v1374_v20 }
 0x2d7   : > { %1486 = vrot.lane.b32.xlu1 %v1483_v2, %s2139_s30 }
 0x2d9   : > { %v1431_v8 = vpop.permute.xlu1 %1430 }
 0x2da   : > { %v1434_v9 = vsel %vm1426_vm2, %v1431_v8, %v1428_v58 }
 0x2db   : > { %1548 = vrot.lane.b32.xlu1 %v1315_v47, %s2139_s30 }
 0x2dd   : > { %v1459_v59 = vpop.permute.xlu1 %1458 }
 0x2de   : > { %v1460_v63 = vsel %vm1426_vm2, %v1459_v59, %v1371_v0 }
 0x2df   : > { %1588 = vrot.lane.b32.xlu1 %v2699_v5, %s2139_s30 }
 0x2e3   : > { %v1546_v19 = vpop.permute.xlu0 %1545  ;;  %1443 = vrot.lane.b32.xlu1 %v1434_v9, %s2140_s7 }
 0x2e4   : > { %v1547_v48 = vsel %vm1426_vm2, %v1546_v19, %v1387_v36 }
 0x2e5   : > { %1550 = vrot.lane.b32.xlu0 %v1547_v48, %s2139_s30 }
 0x2e7   : > { %1466 = vrot.lane.b32.xlu1 %v1293_v52, %s2141_s8 }
 0x2e9   : > { %1441 = vrot.lane.b32.xlu0 %v1429_v24, %s2140_s7 }
 0x2eb   : > { %1470 = vrot.lane.b32.xlu1 %v1460_v63, %s2141_s8 }
 0x2ed   : > { %1468 = vrot.lane.b32.xlu0 %v1295_v12, %s2141_s8 }
 0x2f1   : > { %1493 = vrot.lane.b32.xlu0 %v1483_v2, %s2142_s9 }
 0x2f5   : > { %1513 = vrot.lane.b32.xlu0 %v1305_v37, %s2143_s10 }
 0x2f9   : > { %1530 = vrot.lane.b32.xlu0 %v1307_v55, %s2144_s11 }
 0x33f   : > { %v1433_v23 = vpop.permute.xlu0 %1432 }
 0x340   : > { %v1435_v44 = vsel %vm1426_vm2, %v1433_v23, %v1431_v8 }
 0x343   : > { %v1485_v42 = vpop.permute.xlu0 %1484 }
 0x344   : > { %v1488_v60 = vsel %vm1426_vm2, %v1485_v42, %v1482_v27 }
 0x345   : > { %1495 = vrot.lane.b32.xlu1 %v1488_v60, %s2142_s9 }
 0x347   : > { %v1525_v11 = vpop.permute.xlu0 %1524 }
 0x348   : > { %v1526_v54 = vsel %vm1426_vm2, %v1525_v11, %v1382_v38 }
 0x349   : > { %v1487_v51 = vpop.permute.xlu1 %1486  ;;  %1534 = vrot.lane.b32.xlu0 %v1526_v54, %s2144_s11  ;;  %1511 = vrot.lane.b32.xlu1 %v2689_v40, %s2143_s10 }
 0x34a   : > { %v1489_v43 = vsel %vm1426_vm2, %v1487_v51, %v1485_v42 }
 0x34d   : > { %1612 = vperm.xlu0 %1912, %v1609_v16   ;;  %v1549_v46 = vpop.permute.xlu1 %1548  ;;  %1515 = vrot.lane.b32.xlu1 %v2687_v32, %s2143_s10  ;;  %v1061_v32 = vand.u32 127, %v1060_v33 }
 0x34e   : > { %v1552_v18 = vsel %vm1426_vm2, %v1549_v46, %v1546_v19 }
 0x34f   : > { %v1406_v37 = vand.u32 15, %v1061_v32  ;;  %v1401_v38 = vadd.s32 128, %v1061_v32 }
 0x351   : > { %1559 = vrot.lane.b32.xlu0 %v1552_v18, %s2145_s14  ;;  %1532 = vrot.lane.b32.xlu1 %v2691_v49, %s2144_s11  ;;  %v1589_v45 = vpop.permute.xlu1 %1588  ;;  %vm2738_vm5 = vcmp.eq.s32.totalorder %v1406_v37, 0  ;;  %vm2743_vm7 = vcmp.eq.s32.totalorder %v1406_v37, 15 }
 0x352   : > { %v1590_v61 = vsel %vm1426_vm2, %v1589_v45, %v1395_v26 }
 0x355   : > { %1445 = vrot.lane.b32.xlu0 %v1435_v44, %s2140_s7  ;;  %1575 = vrot.lane.b32.xlu1 %v1317_v35, %s2146_s15  ;;  %v1444_v7 = vpop.permute.xlu1 %1443  ;;  %v1413_v35 = vand.u32 15, %v1401_v38 }
 0x357   : > { %v1551_v14 = vpop.permute.xlu0 %1550  ;;  %vm2754_vm8 = vcmp.eq.s32.totalorder %v1413_v35, 0  ;;  %vm2758_vm9 = vcmp.eq.s32.totalorder %v1413_v35, 15 }
 0x358   : > { %v1553_v21 = vsel %vm1426_vm2, %v1551_v14, %v1549_v46 }
 0x359   : > { %1497 = vrot.lane.b32.xlu0 %v1489_v43, %s2142_s9  ;;  %1557 = vrot.lane.b32.xlu1 %v1547_v48, %s2145_s14  ;;  %v1467_v31 = vpop.permute.xlu1 %1466 }
 0x35b   : > { %v1442_v10 = vpop.permute.xlu0 %1441 }
 0x35c   : > { %v1448_v49 = vsel %vm1447_vm3, %v1442_v10, %v1444_v7 }
 0x35d   : > { %1577 = vrot.lane.b32.xlu0 %v2695_v30, %s2146_s15  ;;  %1579 = vrot.lane.b32.xlu1 %v2697_v25, %s2146_s15  ;;  %v1471_v3 = vpop.permute.xlu1 %1470  ;;  %v1452_v47 = vsel %vm2738_vm5, 0.0, %v1448_v49 }
 0x35f   : > { %v1469_v34 = vpop.permute.xlu0 %1468 }
 0x360   : > { %v1473_v53 = vsel %vm1472_vm4, %v1467_v31, %v1469_v34  ;;  %v1474_v27 = vsel %vm1472_vm4, %v1469_v34, %v1471_v3 }
 0x361   : > { %1594 = vrot.lane.b32.xlu0 %v2699_v5, %s2147_s16  ;;  %1561 = vrot.lane.b32.xlu1 %v1553_v21, %s2145_s14  ;;  %v1477_v15 = vsel %vm2743_vm7, 0.0, %v1473_v53  ;;  %v1456_v5 = vadd.f32 %v1452_v47, %v2681_v1  ;;  %v1478_v59 = vsel %vm2758_vm9, 0.0, %v1474_v27 }
 0x363   : > { %v1494_v52 = vpop.permute.xlu0 %1493  ;;  %v1479_v2 = vadd.f32 %v1477_v15, %v1456_v5 }
 0x365   : > { %1596 = vrot.lane.b32.xlu1 %v2701_v13, %s2147_s16  ;;  %1598 = vrot.lane.b32.xlu0 %v1590_v61, %s2147_s16 }
 0x367   : > { %v1514_v12 = vpop.permute.xlu0 %1513 }
 0x36b   : > { %v1531_v17 = vpop.permute.xlu0 %1530 }
 0x3b7   : > { %v1496_v0 = vpop.permute.xlu1 %1495 }
 0x3b8   : > { %v1500_v25 = vsel %vm1499_vm6, %v1494_v52, %v1496_v0 }
 0x3b9   : > { %v1504_v56 = vsel %vm2738_vm5, 0.0, %v1500_v25 }
 0x3ba   : > { %v1506_v9 = vadd.f32 %v1504_v56, %v1479_v2 }
 0x3bb   : > { %v1512_v29 = vpop.permute.xlu1 %1511  ;;  %v1535_v40 = vpop.permute.xlu0 %1534 }
 0x3bc   : > { %v1518_v63 = vsel %vm1517_vm11, %v1512_v29, %v1514_v12 }
 0x3bd   : > { %v1522_v11 = vadd.f32 %v1518_v63, %v1506_v9 }
 0x3bf   : > { %v1516_v20 = vpop.permute.xlu1 %1515 }
 0x3c0   : > { %v1519_v51 = vsel %vm1517_vm11, %v1514_v12, %v1516_v20 }
 0x3c3   : > { %v1533_v28 = vpop.permute.xlu1 %1532 }
 0x3c4   : > { %v1537_v19 = vsel %vm1536_vm10, %v1531_v17, %v1533_v28 }
 0x3c5   : > { %v1541_v23 = vsel %vm2743_vm7, 0.0, %v1537_v19 }
 0x3c6   : > { %v1543_v18 = vadd.f32 %v1541_v23, %v1522_v11 }
 0x3c7   : > { %v1576_v39 = vpop.permute.xlu1 %1575 }
 0x3cb   : > { %v1558_v36 = vpop.permute.xlu1 %1557 }
 0x3cc   : > { %v2736_v55 = vpop.permute.xlu0 %1612 }
 0x3cf   : > { %v1580_v58 = vpop.permute.xlu1 %1579 }
 0x3d0   : > { %v1560_v30 = vpop.permute.xlu0 %1559 }
 0x3d1   : > { %v1564_v6 = vsel %vm1563_vm12, %v1558_v36, %v1560_v30 }
 0x3d2   : > { %v1568_v16 = vsel %vm2738_vm5, 0.0, %v1564_v6 }
 0x3d3   : > { %v1562_v42 = vpop.permute.xlu1 %1561  ;;  %v1570_v45 = vadd.f32 %v1568_v16, %v1543_v18 }
 0x3d4   : > { %v1446_v24 = vpop.permute.xlu0 %1445  ;;  %v1565_v44 = vsel %vm1563_vm12, %v1560_v30, %v1562_v42 }
 0x3d5   : > { %v1449_v1 = vsel %vm1447_vm3, %v1444_v7, %v1446_v24  ;;  %v1569_v7 = vsel %vm2754_vm8, 0.0, %v1565_v44 }
 0x3d6   : > { %v1453_v8 = vsel %vm2754_vm8, 0.0, %v1449_v1 }
 0x3d7   : > { %v1457_v48 = vadd.f32 %v1453_v8, %v2683_v57  ;;  %v1538_v57 = vsel %vm1536_vm10, %v1533_v28, %v1535_v40  ;;  %v1597_v10 = vpop.permute.xlu1 %1596 }
 0x3d8   : > { %v1498_v26 = vpop.permute.xlu0 %1497  ;;  %v1542_v14 = vsel %vm2758_vm9, 0.0, %v1538_v57 }
 0x3d9   : > { %v1480_v22 = vadd.f32 %v1478_v59, %v1457_v48  ;;  %v1501_v41 = vsel %vm1499_vm6, %v1496_v0, %v1498_v26 }
 0x3da   : > { %v1505_v60 = vsel %vm2754_vm8, 0.0, %v1501_v41 }
 0x3db   : > { %v1507_v54 = vadd.f32 %v1505_v60, %v1480_v22 }
 0x3dc   : > { %v1578_v46 = vpop.permute.xlu0 %1577 }
 0x3dd   : > { %v1523_v43 = vadd.f32 %v1519_v51, %v1507_v54  ;;  %v1582_v21 = vsel %vm1581_vm13, %v1576_v39, %v1578_v46  ;;  %v1583_v12 = vsel %vm1581_vm13, %v1578_v46, %v1580_v58 }
 0x3de   : > { %v1586_v3 = vadd.f32 %v1582_v21, %v1570_v45 }
 0x3df   : > { %v1544_v61 = vadd.f32 %v1542_v14, %v1523_v43 }
 0x3e0   : > { %v1595_v31 = vpop.permute.xlu0 %1594 }
 0x3e1   : > { %v1571_v34 = vadd.f32 %v1569_v7, %v1544_v61  ;;  %v1601_v0 = vsel %vm1600_vm14, %v1595_v31, %v1597_v10 }
 0x3e2   : > { %v1605_v52 = vsel %vm2743_vm7, 0.0, %v1601_v0 }
 0x3e3   : > { %v1607_v29 = vadd.f32 %v1605_v52, %v1586_v3  ;;  %v1587_v33 = vadd.f32 %v1583_v12, %v1571_v34 }
 0x3e4   : > { %v1599_v20 = vpop.permute.xlu0 %1598 }
 0x3e5   : > { %v1615_v28 = vadd.f32 %v2736_v55, %v1607_v29  ;;  %v1602_v17 = vsel %vm1600_vm14, %v1597_v10, %v1599_v20 }
 0x3e6   : > { %v1606_v32 = vsel %vm2758_vm9, 0.0, %v1602_v17 }
 0x3e7   : > { %1617 = vst [vmem:[%s363_s20] sm:$0xff] %v1615_v28  ;;  %v1608_v40 = vadd.f32 %v1606_v32, %v1587_v33 }
 0x3e9   : > { %v1616_v39 = vadd.f32 %v2736_v55, %v1608_v40 }
 0x3eb   : > { %1618 = vst [vmem:[%s363_s20 + $0x8] sm:$0xff] %v1616_v39 }
 0x3ec PF: > { %s16_s23 = sadd.s32 1, %s2133_s23   ;;  %s2826_s21 = smov %s2129_s22 }
 0x3ed   : > { %p13_p5 = scmp.ge.s32.totalorder %s16_s23, 4   ;;  %s2827_s22 = smov %s2829_s24 }
 0x3ef   :  { %15 = sbr.rel (!%p13_p5) target bundleno = 2 (0x2), region = 83 }

</bundles_post_ra>
